<compile_context>
chip_gen: v7x
topology: tpu7x:2x2x1
jax: 0.10.0
libtpu: 0.0.40
codegen_flags: <defaults>
</compile_context>

<pallas_src>
import functools

import jax
import jax.numpy as jnp
from jax import lax
from jax.experimental import pallas as pl
from jax.experimental.pallas import tpu as pltpu


def _pendulum_rnn_kernel(x_ref, wih1_ref, whh1_ref, b1_ref,
                         w2_ref, b2_ref, wlin_ref, blin_ref, out_ref,
                         *, hidden_dim, seq_len, future, total_pad):
    H = hidden_dim
    Bp = x_ref.shape[1]          # padded batch (sublane dim)
    total = seq_len + future

    # Packed weights: gate order [i, f, o, g]; i/f/o columns pre-scaled by 0.5.
    wih1 = wih1_ref[...]          # (1, 4H)
    whh1 = whh1_ref[...]          # (H, 4H)
    b1 = b1_ref[...]              # (1, 4H)
    w2 = w2_ref[...]              # (2H, 4H) = [W_ih2 ; W_hh2] fused
    b2 = b2_ref[...]              # (1, 4H)
    wlin = wlin_ref[...]          # (1, H)
    blin = blin_ref[...]          # (1, 1)

    # Hoist every teacher-forced layer-1 gate input out of the recurrence:
    # (seq, Bp, 1) * (1, 4H) -> (seq, Bp, 4H), bias included.
    xg1_all = x_ref[...][:, :, None] * wih1 + b1

    def cell(gates, c):
        # `gates` already carries the 0.5 pre-scale on the i/f/o columns, so a
        # single full-tile tanh covers all four gates:
        #   sigmoid(x) = 0.5 * tanh(0.5 * x) + 0.5
        t = jnp.tanh(gates)
        i = 0.5 * t[:, 0 * H:1 * H] + 0.5
        f = 0.5 * t[:, 1 * H:2 * H] + 0.5
        o = 0.5 * t[:, 2 * H:3 * H] + 0.5
        g = t[:, 3 * H:4 * H]
        c_new = f * c + i * g
        h_new = o * jnp.tanh(c_new)
        return h_new, c_new

    col_ids = lax.broadcasted_iota(jnp.int32, (Bp, total_pad), 1)

    zeros = jnp.zeros((Bp, H), jnp.float32)
    h1 = c1 = h2 = c2 = zeros
    out_col = jnp.zeros((Bp, 1), jnp.float32)
    out_acc = jnp.zeros((Bp, total_pad), jnp.float32)

    # Fully unrolled recurrence, split into teacher-forced / autoregressive.
    for t in range(total):
        if t < seq_len:
            xg1 = xg1_all[t]                      # precomputed, off critical path
        else:
            xg1 = out_col * wih1 + b1             # feed back previous prediction

        # Layer 1.
        g1 = xg1 + jnp.dot(h1, whh1, preferred_element_type=jnp.float32)
        h1, c1 = cell(g1, c1)

        # Layer 2: single fused MXU matmul over [h1, h2].
        h12 = jnp.concatenate([h1, h2], axis=1)   # (Bp, 2H)
        g2 = jnp.dot(h12, w2, preferred_element_type=jnp.float32) + b2
        h2, c2 = cell(g2, c2)

        # Linear head (N=1): VPU multiply + lane reduce, keeps the MXU free.
        out_col = jnp.sum(h2 * wlin, axis=1, keepdims=True) + blin

        # Accumulate into a lane-dense tile; one store after the loop.
        out_acc = jnp.where(col_ids == t, out_col, out_acc)

    out_ref[...] = out_acc


def _pack_gates(w, hidden_dim):
    """Reorder gate blocks [i,f,g,o] -> [i,f,o,g]; pre-scale i/f/o by 0.5."""
    H = hidden_dim
    i = w[..., 0 * H:1 * H]
    f = w[..., 1 * H:2 * H]
    g = w[..., 2 * H:3 * H]
    o = w[..., 3 * H:4 * H]
    return jnp.concatenate([0.5 * i, 0.5 * f, 0.5 * o, g], axis=-1)


def pendulum_rnn_forward(x, params, hidden_dim, future=0):
    """x: (batch, seq_len) float32 -> (batch, seq_len + future) float32."""
    (wih1, whh1, b1, wih2, whh2, b2, wlin, blin) = params
    H = hidden_dim
    batch, seq_len = x.shape
    total = seq_len + future

    batch_pad = max(8, -(-batch // 8) * 8)          # sublane-align batch
    total_pad = max(128, -(-total // 128) * 128)    # lane-dense output tile

    # Pack parameters into the kernel layout (gate reorder + 0.5 pre-scale,
    # fused layer-2 weight).  In a real model this packing is done once at init.
    wih1p = _pack_gates(wih1, H)                                  # (1, 4H)
    whh1p = _pack_gates(whh1, H)                                  # (H, 4H)
    b1p = _pack_gates(b1, H)                                      # (1, 4H)
    w2p = _pack_gates(jnp.concatenate([wih2, whh2], axis=0), H)   # (2H, 4H)
    b2p = _pack_gates(b2, H)                                      # (1, 4H)
    wlin_row = wlin.reshape(1, H)                                 # (1, H)

    # (batch, seq) -> (seq, batch_pad): time on the leading (untiled) axis,
    # batch padded to a full 8-sublane tile.
    x_t = jnp.zeros((seq_len, batch_pad), jnp.float32)
    x_t = x_t.at[:, :batch].set(jnp.transpose(x).astype(jnp.float32))

    kernel = functools.partial(_pendulum_rnn_kernel, hidden_dim=H,
                               seq_len=seq_len, future=future,
                               total_pad=total_pad)

    out = pl.pallas_call(
        kernel,
        out_shape=jax.ShapeDtypeStruct((batch_pad, total_pad), jnp.float32),
        in_specs=[pl.BlockSpec(memory_space=pltpu.MemorySpace.VMEM)] * 8,
        out_specs=pl.BlockSpec(memory_space=pltpu.MemorySpace.VMEM),
    )(x_t, wih1p, whh1p, b1p, w2p, b2p, wlin_row, blin)

    return out[:batch, :total]


def init_params(key, hidden_dim):
    """Deterministic params in the canonical (PyTorch-equivalent) layout.

    PyTorch shapes:
      lstm1.weight_ih (4H,1)  lstm1.weight_hh (4H,H)  biases (4H,)
      lstm2.weight_ih (4H,H)  lstm2.weight_hh (4H,H)  biases (4H,)
      linear.weight  (1,H)    linear.bias (1,)
    Here: weights transposed (matmuls are h @ W), LSTM biases pre-summed
    (b_ih + b_hh), gate order [i, f, g, o] as in PyTorch.
    """
    H = hidden_dim
    scale = 1.0 / (H ** 0.5)
    ks = jax.random.split(key, 12)

    def u(k, shape):
        return jax.random.uniform(k, shape, jnp.float32, -scale, scale)

    wih1 = u(ks[0], (1, 4 * H))          # weight_ih_l1^T
    whh1 = u(ks[1], (H, 4 * H))          # weight_hh_l1^T
    b1 = u(ks[2], (1, 4 * H)) + u(ks[3], (1, 4 * H))
    wih2 = u(ks[4], (H, 4 * H))          # weight_ih_l2^T
    whh2 = u(ks[5], (H, 4 * H))          # weight_hh_l2^T
    b2 = u(ks[6], (1, 4 * H)) + u(ks[7], (1, 4 * H))
    wlin = u(ks[8], (H, 1))              # linear.weight^T
    blin = u(ks[9], (1, 1))
    return (wih1, whh1, b1, wih2, whh2, b2, wlin, blin)


def reference_forward(x, params, hidden_dim, future=0):
    """Pure-JAX reference with the module's exact math (correctness check)."""
    (wih1, whh1, b1, wih2, whh2, b2, wlin, blin) = params
    H = hidden_dim
    batch, seq_len = x.shape

    def cell(xg, h, c, w_hh, b):
        gates = xg + h @ w_hh + b
        i = jax.nn.sigmoid(gates[:, 0 * H:1 * H])
        f = jax.nn.sigmoid(gates[:, 1 * H:2 * H])
        g = jnp.tanh(gates[:, 2 * H:3 * H])
        o = jax.nn.sigmoid(gates[:, 3 * H:4 * H])
        c_new = f * c + i * g
        return o * jnp.tanh(c_new), c_new

    h1 = c1 = h2 = c2 = jnp.zeros((batch, H), jnp.float32)
    outputs = []
    out = jnp.zeros((batch, 1), jnp.float32)
    for t in range(seq_len + future):
        x_t = x[:, t:t + 1] if t < seq_len else out
        h1, c1 = cell(x_t * wih1, h1, c1, whh1, b1)
        h2, c2 = cell(h1 @ wih2, h2, c2, whh2, b2)
        out = h2 @ wlin + blin
        outputs.append(out)
    return jnp.concatenate(outputs, axis=1)


if __name__ == "__main__":
    batch, seq_len, hidden_dim, future = 2, 8, 32, 4

    key = jax.random.PRNGKey(0)
    kx, kp = jax.random.split(key)
    x = jax.random.normal(kx, (batch, seq_len), jnp.float32)
    params = init_params(kp, hidden_dim)

    out = pendulum_rnn_forward(x, params, hidden_dim, future=future)
    out = jax.block_until_ready(out)

    ref = reference_forward(x, params, hidden_dim, future=future)
    assert out.shape == (batch, seq_len + future), out.shape
    err = jnp.max(jnp.abs(out - ref))
    # Tolerance relaxed slightly vs 1e-5: the kernel uses the (exact) identity
    # sigmoid(x) = 0.5*tanh(x/2)+0.5 and a fused layer-2 matmul, which only
    # reassociate float32 arithmetic.
    assert jnp.allclose(out, ref, atol=1e-4, rtol=1e-4), f"max abs err = {err}"

    print("KERNEL_OK")
</pallas_src>

<mosaic_0001>
module attributes {stable_mosaic.version = 11 : i64} {
  func.func @_pendulum_rnn_kernel(%arg0: memref<8x8xf32, #tpu.memory_space<vmem>>, %arg1: memref<1x128xf32, #tpu.memory_space<vmem>>, %arg2: memref<32x128xf32, #tpu.memory_space<vmem>>, %arg3: memref<1x128xf32, #tpu.memory_space<vmem>>, %arg4: memref<64x128xf32, #tpu.memory_space<vmem>>, %arg5: memref<1x128xf32, #tpu.memory_space<vmem>>, %arg6: memref<1x32xf32, #tpu.memory_space<vmem>>, %arg7: memref<1x1xf32, #tpu.memory_space<vmem>>, %arg8: memref<8x128xf32, #tpu.memory_space<vmem>>) attributes {dimension_semantics = [], scalar_prefetch = 0 : i64, scratch_operands = 0 : i64, tpu.core_type = #tpu.core_type<tc>} {
    %c0 = arith.constant 0 : index
    %c0_0 = arith.constant 0 : index
    %0 = vector.load %arg1[%c0, %c0_0] : memref<1x128xf32, #tpu.memory_space<vmem>>, vector<1x128xf32>
    %c0_1 = arith.constant 0 : index
    %c0_2 = arith.constant 0 : index
    %1 = vector.load %arg2[%c0_1, %c0_2] : memref<32x128xf32, #tpu.memory_space<vmem>>, vector<32x128xf32>
    %c0_3 = arith.constant 0 : index
    %c0_4 = arith.constant 0 : index
    %2 = vector.load %arg3[%c0_3, %c0_4] : memref<1x128xf32, #tpu.memory_space<vmem>>, vector<1x128xf32>
    %c0_5 = arith.constant 0 : index
    %c0_6 = arith.constant 0 : index
    %3 = vector.load %arg4[%c0_5, %c0_6] : memref<64x128xf32, #tpu.memory_space<vmem>>, vector<64x128xf32>
    %c0_7 = arith.constant 0 : index
    %c0_8 = arith.constant 0 : index
    %4 = vector.load %arg5[%c0_7, %c0_8] : memref<1x128xf32, #tpu.memory_space<vmem>>, vector<1x128xf32>
    %c0_9 = arith.constant 0 : index
    %c0_10 = arith.constant 0 : index
    %5 = vector.load %arg6[%c0_9, %c0_10] : memref<1x32xf32, #tpu.memory_space<vmem>>, vector<1x32xf32>
    %c0_11 = arith.constant 0 : index
    %c0_12 = arith.constant 0 : index
    %6 = vector.load %arg7[%c0_11, %c0_12] : memref<1x1xf32, #tpu.memory_space<vmem>>, vector<1x1xf32>
    %c0_13 = arith.constant 0 : index
    %c0_14 = arith.constant 0 : index
    %7 = vector.load %arg0[%c0_13, %c0_14] : memref<8x8xf32, #tpu.memory_space<vmem>>, vector<8x8xf32>
    %8 = vector.shape_cast %7 : vector<8x8xf32> to vector<8x8x1xf32>
    %9 = vector.shape_cast %0 : vector<1x128xf32> to vector<1x1x128xf32>
    %10 = vector.broadcast %8 : vector<8x8x1xf32> to vector<8x8x128xf32>
    %11 = vector.broadcast %9 : vector<1x1x128xf32> to vector<8x8x128xf32>
    %12 = arith.mulf %10, %11 : vector<8x8x128xf32>
    %13 = vector.shape_cast %2 : vector<1x128xf32> to vector<1x1x128xf32>
    %14 = vector.broadcast %13 : vector<1x1x128xf32> to vector<8x8x128xf32>
    %15 = arith.addf %12, %14 : vector<8x8x128xf32>
    %16 = tpu.iota {dimensions = array<i32: 1>} : vector<8x128xi32>
    %cst = arith.constant 0.000000e+00 : f32
    %17 = vector.broadcast %cst : f32 to vector<8x32xf32>
    %cst_15 = arith.constant 0.000000e+00 : f32
    %18 = vector.broadcast %cst_15 : f32 to vector<8x128xf32>
    %19 = vector.extract_strided_slice %15 {offsets = [0, 0, 0], sizes = [1, 8, 128], strides = [1, 1, 1]} : vector<8x8x128xf32> to vector<1x8x128xf32>
    %20 = vector.shape_cast %19 : vector<1x8x128xf32> to vector<8x128xf32>
    %cst_16 = arith.constant dense<0.000000e+00> : vector<8x128xf32>
    %21 = tpu.matmul %17, %1, %cst_16 {dimension_numbers = #tpu.dot_dimension_numbers<[1], [0], [0], [1], [0, 0, 1, 1], [], []>} : vector<8x32xf32>, vector<32x128xf32>, vector<8x128xf32> -> vector<8x128xf32>
    %22 = arith.addf %20, %21 : vector<8x128xf32>
    %23 = math.tanh %22 : vector<8x128xf32>
    %24 = vector.extract_strided_slice %23 {offsets = [0, 0], sizes = [8, 32], strides = [1, 1]} : vector<8x128xf32> to vector<8x32xf32>
    %cst_17 = arith.constant 5.000000e-01 : f32
    %25 = vector.broadcast %cst_17 : f32 to vector<8x32xf32>
    %26 = arith.mulf %25, %24 : vector<8x32xf32>
    %cst_18 = arith.constant 5.000000e-01 : f32
    %27 = vector.broadcast %cst_18 : f32 to vector<8x32xf32>
    %28 = arith.addf %26, %27 : vector<8x32xf32>
    %29 = vector.extract_strided_slice %23 {offsets = [0, 32], sizes = [8, 32], strides = [1, 1]} : vector<8x128xf32> to vector<8x32xf32>
    %cst_19 = arith.constant 5.000000e-01 : f32
    %30 = vector.broadcast %cst_19 : f32 to vector<8x32xf32>
    %31 = arith.mulf %30, %29 : vector<8x32xf32>
    %cst_20 = arith.constant 5.000000e-01 : f32
    %32 = vector.broadcast %cst_20 : f32 to vector<8x32xf32>
    %33 = arith.addf %31, %32 : vector<8x32xf32>
    %34 = vector.extract_strided_slice %23 {offsets = [0, 64], sizes = [8, 32], strides = [1, 1]} : vector<8x128xf32> to vector<8x32xf32>
    %cst_21 = arith.constant 5.000000e-01 : f32
    %35 = vector.broadcast %cst_21 : f32 to vector<8x32xf32>
    %36 = arith.mulf %35, %34 : vector<8x32xf32>
    %cst_22 = arith.constant 5.000000e-01 : f32
    %37 = vector.broadcast %cst_22 : f32 to vector<8x32xf32>
    %38 = arith.addf %36, %37 : vector<8x32xf32>
    %39 = vector.extract_strided_slice %23 {offsets = [0, 96], sizes = [8, 32], strides = [1, 1]} : vector<8x128xf32> to vector<8x32xf32>
    %40 = arith.mulf %33, %17 : vector<8x32xf32>
    %41 = arith.mulf %28, %39 : vector<8x32xf32>
    %42 = arith.addf %40, %41 : vector<8x32xf32>
    %43 = math.tanh %42 : vector<8x32xf32>
    %44 = arith.mulf %38, %43 : vector<8x32xf32>
    %45 = tpu.concatenate %44, %17 in 1 : vector<8x32xf32>, vector<8x32xf32> -> vector<8x64xf32>
    %cst_23 = arith.constant dense<0.000000e+00> : vector<8x128xf32>
    %46 = tpu.matmul %45, %3, %cst_23 {dimension_numbers = #tpu.dot_dimension_numbers<[1], [0], [0], [1], [0, 0, 1, 1], [], []>} : vector<8x64xf32>, vector<64x128xf32>, vector<8x128xf32> -> vector<8x128xf32>
    %47 = vector.broadcast %4 : vector<1x128xf32> to vector<8x128xf32>
    %48 = arith.addf %46, %47 : vector<8x128xf32>
    %49 = math.tanh %48 : vector<8x128xf32>
    %50 = vector.extract_strided_slice %49 {offsets = [0, 0], sizes = [8, 32], strides = [1, 1]} : vector<8x128xf32> to vector<8x32xf32>
    %cst_24 = arith.constant 5.000000e-01 : f32
    %51 = vector.broadcast %cst_24 : f32 to vector<8x32xf32>
    %52 = arith.mulf %51, %50 : vector<8x32xf32>
    %cst_25 = arith.constant 5.000000e-01 : f32
    %53 = vector.broadcast %cst_25 : f32 to vector<8x32xf32>
    %54 = arith.addf %52, %53 : vector<8x32xf32>
    %55 = vector.extract_strided_slice %49 {offsets = [0, 32], sizes = [8, 32], strides = [1, 1]} : vector<8x128xf32> to vector<8x32xf32>
    %cst_26 = arith.constant 5.000000e-01 : f32
    %56 = vector.broadcast %cst_26 : f32 to vector<8x32xf32>
    %57 = arith.mulf %56, %55 : vector<8x32xf32>
    %cst_27 = arith.constant 5.000000e-01 : f32
    %58 = vector.broadcast %cst_27 : f32 to vector<8x32xf32>
    %59 = arith.addf %57, %58 : vector<8x32xf32>
    %60 = vector.extract_strided_slice %49 {offsets = [0, 64], sizes = [8, 32], strides = [1, 1]} : vector<8x128xf32> to vector<8x32xf32>
    %cst_28 = arith.constant 5.000000e-01 : f32
    %61 = vector.broadcast %cst_28 : f32 to vector<8x32xf32>
    %62 = arith.mulf %61, %60 : vector<8x32xf32>
    %cst_29 = arith.constant 5.000000e-01 : f32
    %63 = vector.broadcast %cst_29 : f32 to vector<8x32xf32>
    %64 = arith.addf %62, %63 : vector<8x32xf32>
    %65 = vector.extract_strided_slice %49 {offsets = [0, 96], sizes = [8, 32], strides = [1, 1]} : vector<8x128xf32> to vector<8x32xf32>
    %66 = arith.mulf %59, %17 : vector<8x32xf32>
    %67 = arith.mulf %54, %65 : vector<8x32xf32>
    %68 = arith.addf %66, %67 : vector<8x32xf32>
    %69 = math.tanh %68 : vector<8x32xf32>
    %70 = arith.mulf %64, %69 : vector<8x32xf32>
    %71 = vector.broadcast %5 : vector<1x32xf32> to vector<8x32xf32>
    %72 = arith.mulf %70, %71 : vector<8x32xf32>
    %cst_30 = arith.constant dense<0.000000e+00> : vector<8xf32>
    %73 = vector.multi_reduction <add>, %72, %cst_30 [1] : vector<8x32xf32> to vector<8xf32>
    %74 = vector.shape_cast %73 : vector<8xf32> to vector<8x1xf32>
    %75 = vector.broadcast %6 : vector<1x1xf32> to vector<8x1xf32>
    %76 = arith.addf %74, %75 : vector<8x1xf32>
    %c0_i32 = arith.constant 0 : i32
    %77 = vector.broadcast %c0_i32 : i32 to vector<8x128xi32>
    %78 = arith.cmpi eq, %16, %77 : vector<8x128xi32>
    %79 = vector.shape_cast %76 : vector<8x1xf32> to vector<8x1xf32>
    %80 = vector.broadcast %79 : vector<8x1xf32> to vector<8x128xf32>
    %81 = arith.select %78, %80, %18 : vector<8x128xi1>, vector<8x128xf32>
    %82 = vector.extract_strided_slice %15 {offsets = [1, 0, 0], sizes = [1, 8, 128], strides = [1, 1, 1]} : vector<8x8x128xf32> to vector<1x8x128xf32>
    %83 = vector.shape_cast %82 : vector<1x8x128xf32> to vector<8x128xf32>
    %cst_31 = arith.constant dense<0.000000e+00> : vector<8x128xf32>
    %84 = tpu.matmul %44, %1, %cst_31 {dimension_numbers = #tpu.dot_dimension_numbers<[1], [0], [0], [1], [0, 0, 1, 1], [], []>} : vector<8x32xf32>, vector<32x128xf32>, vector<8x128xf32> -> vector<8x128xf32>
    %85 = arith.addf %83, %84 : vector<8x128xf32>
    %86 = math.tanh %85 : vector<8x128xf32>
    %87 = vector.extract_strided_slice %86 {offsets = [0, 0], sizes = [8, 32], strides = [1, 1]} : vector<8x128xf32> to vector<8x32xf32>
    %cst_32 = arith.constant 5.000000e-01 : f32
    %88 = vector.broadcast %cst_32 : f32 to vector<8x32xf32>
    %89 = arith.mulf %88, %87 : vector<8x32xf32>
    %cst_33 = arith.constant 5.000000e-01 : f32
    %90 = vector.broadcast %cst_33 : f32 to vector<8x32xf32>
    %91 = arith.addf %89, %90 : vector<8x32xf32>
    %92 = vector.extract_strided_slice %86 {offsets = [0, 32], sizes = [8, 32], strides = [1, 1]} : vector<8x128xf32> to vector<8x32xf32>
    %cst_34 = arith.constant 5.000000e-01 : f32
    %93 = vector.broadcast %cst_34 : f32 to vector<8x32xf32>
    %94 = arith.mulf %93, %92 : vector<8x32xf32>
    %cst_35 = arith.constant 5.000000e-01 : f32
    %95 = vector.broadcast %cst_35 : f32 to vector<8x32xf32>
    %96 = arith.addf %94, %95 : vector<8x32xf32>
    %97 = vector.extract_strided_slice %86 {offsets = [0, 64], sizes = [8, 32], strides = [1, 1]} : vector<8x128xf32> to vector<8x32xf32>
    %cst_36 = arith.constant 5.000000e-01 : f32
    %98 = vector.broadcast %cst_36 : f32 to vector<8x32xf32>
    %99 = arith.mulf %98, %97 : vector<8x32xf32>
    %cst_37 = arith.constant 5.000000e-01 : f32
    %100 = vector.broadcast %cst_37 : f32 to vector<8x32xf32>
    %101 = arith.addf %99, %100 : vector<8x32xf32>
    %102 = vector.extract_strided_slice %86 {offsets = [0, 96], sizes = [8, 32], strides = [1, 1]} : vector<8x128xf32> to vector<8x32xf32>
    %103 = arith.mulf %96, %42 : vector<8x32xf32>
    %104 = arith.mulf %91, %102 : vector<8x32xf32>
    %105 = arith.addf %103, %104 : vector<8x32xf32>
    %106 = math.tanh %105 : vector<8x32xf32>
    %107 = arith.mulf %101, %106 : vector<8x32xf32>
    %108 = tpu.concatenate %107, %70 in 1 : vector<8x32xf32>, vector<8x32xf32> -> vector<8x64xf32>
    %cst_38 = arith.constant dense<0.000000e+00> : vector<8x128xf32>
    %109 = tpu.matmul %108, %3, %cst_38 {dimension_numbers = #tpu.dot_dimension_numbers<[1], [0], [0], [1], [0, 0, 1, 1], [], []>} : vector<8x64xf32>, vector<64x128xf32>, vector<8x128xf32> -> vector<8x128xf32>
    %110 = vector.broadcast %4 : vector<1x128xf32> to vector<8x128xf32>
    %111 = arith.addf %109, %110 : vector<8x128xf32>
    %112 = math.tanh %111 : vector<8x128xf32>
    %113 = vector.extract_strided_slice %112 {offsets = [0, 0], sizes = [8, 32], strides = [1, 1]} : vector<8x128xf32> to vector<8x32xf32>
    %cst_39 = arith.constant 5.000000e-01 : f32
    %114 = vector.broadcast %cst_39 : f32 to vector<8x32xf32>
    %115 = arith.mulf %114, %113 : vector<8x32xf32>
    %cst_40 = arith.constant 5.000000e-01 : f32
    %116 = vector.broadcast %cst_40 : f32 to vector<8x32xf32>
    %117 = arith.addf %115, %116 : vector<8x32xf32>
    %118 = vector.extract_strided_slice %112 {offsets = [0, 32], sizes = [8, 32], strides = [1, 1]} : vector<8x128xf32> to vector<8x32xf32>
    %cst_41 = arith.constant 5.000000e-01 : f32
    %119 = vector.broadcast %cst_41 : f32 to vector<8x32xf32>
    %120 = arith.mulf %119, %118 : vector<8x32xf32>
    %cst_42 = arith.constant 5.000000e-01 : f32
    %121 = vector.broadcast %cst_42 : f32 to vector<8x32xf32>
    %122 = arith.addf %120, %121 : vector<8x32xf32>
    %123 = vector.extract_strided_slice %112 {offsets = [0, 64], sizes = [8, 32], strides = [1, 1]} : vector<8x128xf32> to vector<8x32xf32>
    %cst_43 = arith.constant 5.000000e-01 : f32
    %124 = vector.broadcast %cst_43 : f32 to vector<8x32xf32>
    %125 = arith.mulf %124, %123 : vector<8x32xf32>
    %cst_44 = arith.constant 5.000000e-01 : f32
    %126 = vector.broadcast %cst_44 : f32 to vector<8x32xf32>
    %127 = arith.addf %125, %126 : vector<8x32xf32>
    %128 = vector.extract_strided_slice %112 {offsets = [0, 96], sizes = [8, 32], strides = [1, 1]} : vector<8x128xf32> to vector<8x32xf32>
    %129 = arith.mulf %122, %68 : vector<8x32xf32>
    %130 = arith.mulf %117, %128 : vector<8x32xf32>
    %131 = arith.addf %129, %130 : vector<8x32xf32>
    %132 = math.tanh %131 : vector<8x32xf32>
    %133 = arith.mulf %127, %132 : vector<8x32xf32>
    %134 = vector.broadcast %5 : vector<1x32xf32> to vector<8x32xf32>
    %135 = arith.mulf %133, %134 : vector<8x32xf32>
    %cst_45 = arith.constant dense<0.000000e+00> : vector<8xf32>
    %136 = vector.multi_reduction <add>, %135, %cst_45 [1] : vector<8x32xf32> to vector<8xf32>
    %137 = vector.shape_cast %136 : vector<8xf32> to vector<8x1xf32>
    %138 = vector.broadcast %6 : vector<1x1xf32> to vector<8x1xf32>
    %139 = arith.addf %137, %138 : vector<8x1xf32>
    %c1_i32 = arith.constant 1 : i32
    %140 = vector.broadcast %c1_i32 : i32 to vector<8x128xi32>
    %141 = arith.cmpi eq, %16, %140 : vector<8x128xi32>
    %142 = vector.shape_cast %139 : vector<8x1xf32> to vector<8x1xf32>
    %143 = vector.broadcast %142 : vector<8x1xf32> to vector<8x128xf32>
    %144 = arith.select %141, %143, %81 : vector<8x128xi1>, vector<8x128xf32>
    %145 = vector.extract_strided_slice %15 {offsets = [2, 0, 0], sizes = [1, 8, 128], strides = [1, 1, 1]} : vector<8x8x128xf32> to vector<1x8x128xf32>
    %146 = vector.shape_cast %145 : vector<1x8x128xf32> to vector<8x128xf32>
    %cst_46 = arith.constant dense<0.000000e+00> : vector<8x128xf32>
    %147 = tpu.matmul %107, %1, %cst_46 {dimension_numbers = #tpu.dot_dimension_numbers<[1], [0], [0], [1], [0, 0, 1, 1], [], []>} : vector<8x32xf32>, vector<32x128xf32>, vector<8x128xf32> -> vector<8x128xf32>
    %148 = arith.addf %146, %147 : vector<8x128xf32>
    %149 = math.tanh %148 : vector<8x128xf32>
    %150 = vector.extract_strided_slice %149 {offsets = [0, 0], sizes = [8, 32], strides = [1, 1]} : vector<8x128xf32> to vector<8x32xf32>
    %cst_47 = arith.constant 5.000000e-01 : f32
    %151 = vector.broadcast %cst_47 : f32 to vector<8x32xf32>
    %152 = arith.mulf %151, %150 : vector<8x32xf32>
    %cst_48 = arith.constant 5.000000e-01 : f32
    %153 = vector.broadcast %cst_48 : f32 to vector<8x32xf32>
    %154 = arith.addf %152, %153 : vector<8x32xf32>
    %155 = vector.extract_strided_slice %149 {offsets = [0, 32], sizes = [8, 32], strides = [1, 1]} : vector<8x128xf32> to vector<8x32xf32>
    %cst_49 = arith.constant 5.000000e-01 : f32
    %156 = vector.broadcast %cst_49 : f32 to vector<8x32xf32>
    %157 = arith.mulf %156, %155 : vector<8x32xf32>
    %cst_50 = arith.constant 5.000000e-01 : f32
    %158 = vector.broadcast %cst_50 : f32 to vector<8x32xf32>
    %159 = arith.addf %157, %158 : vector<8x32xf32>
    %160 = vector.extract_strided_slice %149 {offsets = [0, 64], sizes = [8, 32], strides = [1, 1]} : vector<8x128xf32> to vector<8x32xf32>
    %cst_51 = arith.constant 5.000000e-01 : f32
    %161 = vector.broadcast %cst_51 : f32 to vector<8x32xf32>
    %162 = arith.mulf %161, %160 : vector<8x32xf32>
    %cst_52 = arith.constant 5.000000e-01 : f32
    %163 = vector.broadcast %cst_52 : f32 to vector<8x32xf32>
    %164 = arith.addf %162, %163 : vector<8x32xf32>
    %165 = vector.extract_strided_slice %149 {offsets = [0, 96], sizes = [8, 32], strides = [1, 1]} : vector<8x128xf32> to vector<8x32xf32>
    %166 = arith.mulf %159, %105 : vector<8x32xf32>
    %167 = arith.mulf %154, %165 : vector<8x32xf32>
    %168 = arith.addf %166, %167 : vector<8x32xf32>
    %169 = math.tanh %168 : vector<8x32xf32>
    %170 = arith.mulf %164, %169 : vector<8x32xf32>
    %171 = tpu.concatenate %170, %133 in 1 : vector<8x32xf32>, vector<8x32xf32> -> vector<8x64xf32>
    %cst_53 = arith.constant dense<0.000000e+00> : vector<8x128xf32>
    %172 = tpu.matmul %171, %3, %cst_53 {dimension_numbers = #tpu.dot_dimension_numbers<[1], [0], [0], [1], [0, 0, 1, 1], [], []>} : vector<8x64xf32>, vector<64x128xf32>, vector<8x128xf32> -> vector<8x128xf32>
    %173 = vector.broadcast %4 : vector<1x128xf32> to vector<8x128xf32>
    %174 = arith.addf %172, %173 : vector<8x128xf32>
    %175 = math.tanh %174 : vector<8x128xf32>
    %176 = vector.extract_strided_slice %175 {offsets = [0, 0], sizes = [8, 32], strides = [1, 1]} : vector<8x128xf32> to vector<8x32xf32>
    %cst_54 = arith.constant 5.000000e-01 : f32
    %177 = vector.broadcast %cst_54 : f32 to vector<8x32xf32>
    %178 = arith.mulf %177, %176 : vector<8x32xf32>
    %cst_55 = arith.constant 5.000000e-01 : f32
    %179 = vector.broadcast %cst_55 : f32 to vector<8x32xf32>
    %180 = arith.addf %178, %179 : vector<8x32xf32>
    %181 = vector.extract_strided_slice %175 {offsets = [0, 32], sizes = [8, 32], strides = [1, 1]} : vector<8x128xf32> to vector<8x32xf32>
    %cst_56 = arith.constant 5.000000e-01 : f32
    %182 = vector.broadcast %cst_56 : f32 to vector<8x32xf32>
    %183 = arith.mulf %182, %181 : vector<8x32xf32>
    %cst_57 = arith.constant 5.000000e-01 : f32
    %184 = vector.broadcast %cst_57 : f32 to vector<8x32xf32>
    %185 = arith.addf %183, %184 : vector<8x32xf32>
    %186 = vector.extract_strided_slice %175 {offsets = [0, 64], sizes = [8, 32], strides = [1, 1]} : vector<8x128xf32> to vector<8x32xf32>
    %cst_58 = arith.constant 5.000000e-01 : f32
    %187 = vector.broadcast %cst_58 : f32 to vector<8x32xf32>
    %188 = arith.mulf %187, %186 : vector<8x32xf32>
    %cst_59 = arith.constant 5.000000e-01 : f32
    %189 = vector.broadcast %cst_59 : f32 to vector<8x32xf32>
    %190 = arith.addf %188, %189 : vector<8x32xf32>
    %191 = vector.extract_strided_slice %175 {offsets = [0, 96], sizes = [8, 32], strides = [1, 1]} : vector<8x128xf32> to vector<8x32xf32>
    %192 = arith.mulf %185, %131 : vector<8x32xf32>
    %193 = arith.mulf %180, %191 : vector<8x32xf32>
    %194 = arith.addf %192, %193 : vector<8x32xf32>
    %195 = math.tanh %194 : vector<8x32xf32>
    %196 = arith.mulf %190, %195 : vector<8x32xf32>
    %197 = vector.broadcast %5 : vector<1x32xf32> to vector<8x32xf32>
    %198 = arith.mulf %196, %197 : vector<8x32xf32>
    %cst_60 = arith.constant dense<0.000000e+00> : vector<8xf32>
    %199 = vector.multi_reduction <add>, %198, %cst_60 [1] : vector<8x32xf32> to vector<8xf32>
    %200 = vector.shape_cast %199 : vector<8xf32> to vector<8x1xf32>
    %201 = vector.broadcast %6 : vector<1x1xf32> to vector<8x1xf32>
    %202 = arith.addf %200, %201 : vector<8x1xf32>
    %c2_i32 = arith.constant 2 : i32
    %203 = vector.broadcast %c2_i32 : i32 to vector<8x128xi32>
    %204 = arith.cmpi eq, %16, %203 : vector<8x128xi32>
    %205 = vector.shape_cast %202 : vector<8x1xf32> to vector<8x1xf32>
    %206 = vector.broadcast %205 : vector<8x1xf32> to vector<8x128xf32>
    %207 = arith.select %204, %206, %144 : vector<8x128xi1>, vector<8x128xf32>
    %208 = vector.extract_strided_slice %15 {offsets = [3, 0, 0], sizes = [1, 8, 128], strides = [1, 1, 1]} : vector<8x8x128xf32> to vector<1x8x128xf32>
    %209 = vector.shape_cast %208 : vector<1x8x128xf32> to vector<8x128xf32>
    %cst_61 = arith.constant dense<0.000000e+00> : vector<8x128xf32>
    %210 = tpu.matmul %170, %1, %cst_61 {dimension_numbers = #tpu.dot_dimension_numbers<[1], [0], [0], [1], [0, 0, 1, 1], [], []>} : vector<8x32xf32>, vector<32x128xf32>, vector<8x128xf32> -> vector<8x128xf32>
    %211 = arith.addf %209, %210 : vector<8x128xf32>
    %212 = math.tanh %211 : vector<8x128xf32>
    %213 = vector.extract_strided_slice %212 {offsets = [0, 0], sizes = [8, 32], strides = [1, 1]} : vector<8x128xf32> to vector<8x32xf32>
    %cst_62 = arith.constant 5.000000e-01 : f32
    %214 = vector.broadcast %cst_62 : f32 to vector<8x32xf32>
    %215 = arith.mulf %214, %213 : vector<8x32xf32>
    %cst_63 = arith.constant 5.000000e-01 : f32
    %216 = vector.broadcast %cst_63 : f32 to vector<8x32xf32>
    %217 = arith.addf %215, %216 : vector<8x32xf32>
    %218 = vector.extract_strided_slice %212 {offsets = [0, 32], sizes = [8, 32], strides = [1, 1]} : vector<8x128xf32> to vector<8x32xf32>
    %cst_64 = arith.constant 5.000000e-01 : f32
    %219 = vector.broadcast %cst_64 : f32 to vector<8x32xf32>
    %220 = arith.mulf %219, %218 : vector<8x32xf32>
    %cst_65 = arith.constant 5.000000e-01 : f32
    %221 = vector.broadcast %cst_65 : f32 to vector<8x32xf32>
    %222 = arith.addf %220, %221 : vector<8x32xf32>
    %223 = vector.extract_strided_slice %212 {offsets = [0, 64], sizes = [8, 32], strides = [1, 1]} : vector<8x128xf32> to vector<8x32xf32>
    %cst_66 = arith.constant 5.000000e-01 : f32
    %224 = vector.broadcast %cst_66 : f32 to vector<8x32xf32>
    %225 = arith.mulf %224, %223 : vector<8x32xf32>
    %cst_67 = arith.constant 5.000000e-01 : f32
    %226 = vector.broadcast %cst_67 : f32 to vector<8x32xf32>
    %227 = arith.addf %225, %226 : vector<8x32xf32>
    %228 = vector.extract_strided_slice %212 {offsets = [0, 96], sizes = [8, 32], strides = [1, 1]} : vector<8x128xf32> to vector<8x32xf32>
    %229 = arith.mulf %222, %168 : vector<8x32xf32>
    %230 = arith.mulf %217, %228 : vector<8x32xf32>
    %231 = arith.addf %229, %230 : vector<8x32xf32>
    %232 = math.tanh %231 : vector<8x32xf32>
    %233 = arith.mulf %227, %232 : vector<8x32xf32>
    %234 = tpu.concatenate %233, %196 in 1 : vector<8x32xf32>, vector<8x32xf32> -> vector<8x64xf32>
    %cst_68 = arith.constant dense<0.000000e+00> : vector<8x128xf32>
    %235 = tpu.matmul %234, %3, %cst_68 {dimension_numbers = #tpu.dot_dimension_numbers<[1], [0], [0], [1], [0, 0, 1, 1], [], []>} : vector<8x64xf32>, vector<64x128xf32>, vector<8x128xf32> -> vector<8x128xf32>
    %236 = vector.broadcast %4 : vector<1x128xf32> to vector<8x128xf32>
    %237 = arith.addf %235, %236 : vector<8x128xf32>
    %238 = math.tanh %237 : vector<8x128xf32>
    %239 = vector.extract_strided_slice %238 {offsets = [0, 0], sizes = [8, 32], strides = [1, 1]} : vector<8x128xf32> to vector<8x32xf32>
    %cst_69 = arith.constant 5.000000e-01 : f32
    %240 = vector.broadcast %cst_69 : f32 to vector<8x32xf32>
    %241 = arith.mulf %240, %239 : vector<8x32xf32>
    %cst_70 = arith.constant 5.000000e-01 : f32
    %242 = vector.broadcast %cst_70 : f32 to vector<8x32xf32>
    %243 = arith.addf %241, %242 : vector<8x32xf32>
    %244 = vector.extract_strided_slice %238 {offsets = [0, 32], sizes = [8, 32], strides = [1, 1]} : vector<8x128xf32> to vector<8x32xf32>
    %cst_71 = arith.constant 5.000000e-01 : f32
    %245 = vector.broadcast %cst_71 : f32 to vector<8x32xf32>
    %246 = arith.mulf %245, %244 : vector<8x32xf32>
    %cst_72 = arith.constant 5.000000e-01 : f32
    %247 = vector.broadcast %cst_72 : f32 to vector<8x32xf32>
    %248 = arith.addf %246, %247 : vector<8x32xf32>
    %249 = vector.extract_strided_slice %238 {offsets = [0, 64], sizes = [8, 32], strides = [1, 1]} : vector<8x128xf32> to vector<8x32xf32>
    %cst_73 = arith.constant 5.000000e-01 : f32
    %250 = vector.broadcast %cst_73 : f32 to vector<8x32xf32>
    %251 = arith.mulf %250, %249 : vector<8x32xf32>
    %cst_74 = arith.constant 5.000000e-01 : f32
    %252 = vector.broadcast %cst_74 : f32 to vector<8x32xf32>
    %253 = arith.addf %251, %252 : vector<8x32xf32>
    %254 = vector.extract_strided_slice %238 {offsets = [0, 96], sizes = [8, 32], strides = [1, 1]} : vector<8x128xf32> to vector<8x32xf32>
    %255 = arith.mulf %248, %194 : vector<8x32xf32>
    %256 = arith.mulf %243, %254 : vector<8x32xf32>
    %257 = arith.addf %255, %256 : vector<8x32xf32>
    %258 = math.tanh %257 : vector<8x32xf32>
    %259 = arith.mulf %253, %258 : vector<8x32xf32>
    %260 = vector.broadcast %5 : vector<1x32xf32> to vector<8x32xf32>
    %261 = arith.mulf %259, %260 : vector<8x32xf32>
    %cst_75 = arith.constant dense<0.000000e+00> : vector<8xf32>
    %262 = vector.multi_reduction <add>, %261, %cst_75 [1] : vector<8x32xf32> to vector<8xf32>
    %263 = vector.shape_cast %262 : vector<8xf32> to vector<8x1xf32>
    %264 = vector.broadcast %6 : vector<1x1xf32> to vector<8x1xf32>
    %265 = arith.addf %263, %264 : vector<8x1xf32>
    %c3_i32 = arith.constant 3 : i32
    %266 = vector.broadcast %c3_i32 : i32 to vector<8x128xi32>
    %267 = arith.cmpi eq, %16, %266 : vector<8x128xi32>
    %268 = vector.shape_cast %265 : vector<8x1xf32> to vector<8x1xf32>
    %269 = vector.broadcast %268 : vector<8x1xf32> to vector<8x128xf32>
    %270 = arith.select %267, %269, %207 : vector<8x128xi1>, vector<8x128xf32>
    %271 = vector.extract_strided_slice %15 {offsets = [4, 0, 0], sizes = [1, 8, 128], strides = [1, 1, 1]} : vector<8x8x128xf32> to vector<1x8x128xf32>
    %272 = vector.shape_cast %271 : vector<1x8x128xf32> to vector<8x128xf32>
    %cst_76 = arith.constant dense<0.000000e+00> : vector<8x128xf32>
    %273 = tpu.matmul %233, %1, %cst_76 {dimension_numbers = #tpu.dot_dimension_numbers<[1], [0], [0], [1], [0, 0, 1, 1], [], []>} : vector<8x32xf32>, vector<32x128xf32>, vector<8x128xf32> -> vector<8x128xf32>
    %274 = arith.addf %272, %273 : vector<8x128xf32>
    %275 = math.tanh %274 : vector<8x128xf32>
    %276 = vector.extract_strided_slice %275 {offsets = [0, 0], sizes = [8, 32], strides = [1, 1]} : vector<8x128xf32> to vector<8x32xf32>
    %cst_77 = arith.constant 5.000000e-01 : f32
    %277 = vector.broadcast %cst_77 : f32 to vector<8x32xf32>
    %278 = arith.mulf %277, %276 : vector<8x32xf32>
    %cst_78 = arith.constant 5.000000e-01 : f32
    %279 = vector.broadcast %cst_78 : f32 to vector<8x32xf32>
    %280 = arith.addf %278, %279 : vector<8x32xf32>
    %281 = vector.extract_strided_slice %275 {offsets = [0, 32], sizes = [8, 32], strides = [1, 1]} : vector<8x128xf32> to vector<8x32xf32>
    %cst_79 = arith.constant 5.000000e-01 : f32
    %282 = vector.broadcast %cst_79 : f32 to vector<8x32xf32>
    %283 = arith.mulf %282, %281 : vector<8x32xf32>
    %cst_80 = arith.constant 5.000000e-01 : f32
    %284 = vector.broadcast %cst_80 : f32 to vector<8x32xf32>
    %285 = arith.addf %283, %284 : vector<8x32xf32>
    %286 = vector.extract_strided_slice %275 {offsets = [0, 64], sizes = [8, 32], strides = [1, 1]} : vector<8x128xf32> to vector<8x32xf32>
    %cst_81 = arith.constant 5.000000e-01 : f32
    %287 = vector.broadcast %cst_81 : f32 to vector<8x32xf32>
    %288 = arith.mulf %287, %286 : vector<8x32xf32>
    %cst_82 = arith.constant 5.000000e-01 : f32
    %289 = vector.broadcast %cst_82 : f32 to vector<8x32xf32>
    %290 = arith.addf %288, %289 : vector<8x32xf32>
    %291 = vector.extract_strided_slice %275 {offsets = [0, 96], sizes = [8, 32], strides = [1, 1]} : vector<8x128xf32> to vector<8x32xf32>
    %292 = arith.mulf %285, %231 : vector<8x32xf32>
    %293 = arith.mulf %280, %291 : vector<8x32xf32>
    %294 = arith.addf %292, %293 : vector<8x32xf32>
    %295 = math.tanh %294 : vector<8x32xf32>
    %296 = arith.mulf %290, %295 : vector<8x32xf32>
    %297 = tpu.concatenate %296, %259 in 1 : vector<8x32xf32>, vector<8x32xf32> -> vector<8x64xf32>
    %cst_83 = arith.constant dense<0.000000e+00> : vector<8x128xf32>
    %298 = tpu.matmul %297, %3, %cst_83 {dimension_numbers = #tpu.dot_dimension_numbers<[1], [0], [0], [1], [0, 0, 1, 1], [], []>} : vector<8x64xf32>, vector<64x128xf32>, vector<8x128xf32> -> vector<8x128xf32>
    %299 = vector.broadcast %4 : vector<1x128xf32> to vector<8x128xf32>
    %300 = arith.addf %298, %299 : vector<8x128xf32>
    %301 = math.tanh %300 : vector<8x128xf32>
    %302 = vector.extract_strided_slice %301 {offsets = [0, 0], sizes = [8, 32], strides = [1, 1]} : vector<8x128xf32> to vector<8x32xf32>
    %cst_84 = arith.constant 5.000000e-01 : f32
    %303 = vector.broadcast %cst_84 : f32 to vector<8x32xf32>
    %304 = arith.mulf %303, %302 : vector<8x32xf32>
    %cst_85 = arith.constant 5.000000e-01 : f32
    %305 = vector.broadcast %cst_85 : f32 to vector<8x32xf32>
    %306 = arith.addf %304, %305 : vector<8x32xf32>
    %307 = vector.extract_strided_slice %301 {offsets = [0, 32], sizes = [8, 32], strides = [1, 1]} : vector<8x128xf32> to vector<8x32xf32>
    %cst_86 = arith.constant 5.000000e-01 : f32
    %308 = vector.broadcast %cst_86 : f32 to vector<8x32xf32>
    %309 = arith.mulf %308, %307 : vector<8x32xf32>
    %cst_87 = arith.constant 5.000000e-01 : f32
    %310 = vector.broadcast %cst_87 : f32 to vector<8x32xf32>
    %311 = arith.addf %309, %310 : vector<8x32xf32>
    %312 = vector.extract_strided_slice %301 {offsets = [0, 64], sizes = [8, 32], strides = [1, 1]} : vector<8x128xf32> to vector<8x32xf32>
    %cst_88 = arith.constant 5.000000e-01 : f32
    %313 = vector.broadcast %cst_88 : f32 to vector<8x32xf32>
    %314 = arith.mulf %313, %312 : vector<8x32xf32>
    %cst_89 = arith.constant 5.000000e-01 : f32
    %315 = vector.broadcast %cst_89 : f32 to vector<8x32xf32>
    %316 = arith.addf %314, %315 : vector<8x32xf32>
    %317 = vector.extract_strided_slice %301 {offsets = [0, 96], sizes = [8, 32], strides = [1, 1]} : vector<8x128xf32> to vector<8x32xf32>
    %318 = arith.mulf %311, %257 : vector<8x32xf32>
    %319 = arith.mulf %306, %317 : vector<8x32xf32>
    %320 = arith.addf %318, %319 : vector<8x32xf32>
    %321 = math.tanh %320 : vector<8x32xf32>
    %322 = arith.mulf %316, %321 : vector<8x32xf32>
    %323 = vector.broadcast %5 : vector<1x32xf32> to vector<8x32xf32>
    %324 = arith.mulf %322, %323 : vector<8x32xf32>
    %cst_90 = arith.constant dense<0.000000e+00> : vector<8xf32>
    %325 = vector.multi_reduction <add>, %324, %cst_90 [1] : vector<8x32xf32> to vector<8xf32>
    %326 = vector.shape_cast %325 : vector<8xf32> to vector<8x1xf32>
    %327 = vector.broadcast %6 : vector<1x1xf32> to vector<8x1xf32>
    %328 = arith.addf %326, %327 : vector<8x1xf32>
    %c4_i32 = arith.constant 4 : i32
    %329 = vector.broadcast %c4_i32 : i32 to vector<8x128xi32>
    %330 = arith.cmpi eq, %16, %329 : vector<8x128xi32>
    %331 = vector.shape_cast %328 : vector<8x1xf32> to vector<8x1xf32>
    %332 = vector.broadcast %331 : vector<8x1xf32> to vector<8x128xf32>
    %333 = arith.select %330, %332, %270 : vector<8x128xi1>, vector<8x128xf32>
    %334 = vector.extract_strided_slice %15 {offsets = [5, 0, 0], sizes = [1, 8, 128], strides = [1, 1, 1]} : vector<8x8x128xf32> to vector<1x8x128xf32>
    %335 = vector.shape_cast %334 : vector<1x8x128xf32> to vector<8x128xf32>
    %cst_91 = arith.constant dense<0.000000e+00> : vector<8x128xf32>
    %336 = tpu.matmul %296, %1, %cst_91 {dimension_numbers = #tpu.dot_dimension_numbers<[1], [0], [0], [1], [0, 0, 1, 1], [], []>} : vector<8x32xf32>, vector<32x128xf32>, vector<8x128xf32> -> vector<8x128xf32>
    %337 = arith.addf %335, %336 : vector<8x128xf32>
    %338 = math.tanh %337 : vector<8x128xf32>
    %339 = vector.extract_strided_slice %338 {offsets = [0, 0], sizes = [8, 32], strides = [1, 1]} : vector<8x128xf32> to vector<8x32xf32>
    %cst_92 = arith.constant 5.000000e-01 : f32
    %340 = vector.broadcast %cst_92 : f32 to vector<8x32xf32>
    %341 = arith.mulf %340, %339 : vector<8x32xf32>
    %cst_93 = arith.constant 5.000000e-01 : f32
    %342 = vector.broadcast %cst_93 : f32 to vector<8x32xf32>
    %343 = arith.addf %341, %342 : vector<8x32xf32>
    %344 = vector.extract_strided_slice %338 {offsets = [0, 32], sizes = [8, 32], strides = [1, 1]} : vector<8x128xf32> to vector<8x32xf32>
    %cst_94 = arith.constant 5.000000e-01 : f32
    %345 = vector.broadcast %cst_94 : f32 to vector<8x32xf32>
    %346 = arith.mulf %345, %344 : vector<8x32xf32>
    %cst_95 = arith.constant 5.000000e-01 : f32
    %347 = vector.broadcast %cst_95 : f32 to vector<8x32xf32>
    %348 = arith.addf %346, %347 : vector<8x32xf32>
    %349 = vector.extract_strided_slice %338 {offsets = [0, 64], sizes = [8, 32], strides = [1, 1]} : vector<8x128xf32> to vector<8x32xf32>
    %cst_96 = arith.constant 5.000000e-01 : f32
    %350 = vector.broadcast %cst_96 : f32 to vector<8x32xf32>
    %351 = arith.mulf %350, %349 : vector<8x32xf32>
    %cst_97 = arith.constant 5.000000e-01 : f32
    %352 = vector.broadcast %cst_97 : f32 to vector<8x32xf32>
    %353 = arith.addf %351, %352 : vector<8x32xf32>
    %354 = vector.extract_strided_slice %338 {offsets = [0, 96], sizes = [8, 32], strides = [1, 1]} : vector<8x128xf32> to vector<8x32xf32>
    %355 = arith.mulf %348, %294 : vector<8x32xf32>
    %356 = arith.mulf %343, %354 : vector<8x32xf32>
    %357 = arith.addf %355, %356 : vector<8x32xf32>
    %358 = math.tanh %357 : vector<8x32xf32>
    %359 = arith.mulf %353, %358 : vector<8x32xf32>
    %360 = tpu.concatenate %359, %322 in 1 : vector<8x32xf32>, vector<8x32xf32> -> vector<8x64xf32>
    %cst_98 = arith.constant dense<0.000000e+00> : vector<8x128xf32>
    %361 = tpu.matmul %360, %3, %cst_98 {dimension_numbers = #tpu.dot_dimension_numbers<[1], [0], [0], [1], [0, 0, 1, 1], [], []>} : vector<8x64xf32>, vector<64x128xf32>, vector<8x128xf32> -> vector<8x128xf32>
    %362 = vector.broadcast %4 : vector<1x128xf32> to vector<8x128xf32>
    %363 = arith.addf %361, %362 : vector<8x128xf32>
    %364 = math.tanh %363 : vector<8x128xf32>
    %365 = vector.extract_strided_slice %364 {offsets = [0, 0], sizes = [8, 32], strides = [1, 1]} : vector<8x128xf32> to vector<8x32xf32>
    %cst_99 = arith.constant 5.000000e-01 : f32
    %366 = vector.broadcast %cst_99 : f32 to vector<8x32xf32>
    %367 = arith.mulf %366, %365 : vector<8x32xf32>
    %cst_100 = arith.constant 5.000000e-01 : f32
    %368 = vector.broadcast %cst_100 : f32 to vector<8x32xf32>
    %369 = arith.addf %367, %368 : vector<8x32xf32>
    %370 = vector.extract_strided_slice %364 {offsets = [0, 32], sizes = [8, 32], strides = [1, 1]} : vector<8x128xf32> to vector<8x32xf32>
    %cst_101 = arith.constant 5.000000e-01 : f32
    %371 = vector.broadcast %cst_101 : f32 to vector<8x32xf32>
    %372 = arith.mulf %371, %370 : vector<8x32xf32>
    %cst_102 = arith.constant 5.000000e-01 : f32
    %373 = vector.broadcast %cst_102 : f32 to vector<8x32xf32>
    %374 = arith.addf %372, %373 : vector<8x32xf32>
    %375 = vector.extract_strided_slice %364 {offsets = [0, 64], sizes = [8, 32], strides = [1, 1]} : vector<8x128xf32> to vector<8x32xf32>
    %cst_103 = arith.constant 5.000000e-01 : f32
    %376 = vector.broadcast %cst_103 : f32 to vector<8x32xf32>
    %377 = arith.mulf %376, %375 : vector<8x32xf32>
    %cst_104 = arith.constant 5.000000e-01 : f32
    %378 = vector.broadcast %cst_104 : f32 to vector<8x32xf32>
    %379 = arith.addf %377, %378 : vector<8x32xf32>
    %380 = vector.extract_strided_slice %364 {offsets = [0, 96], sizes = [8, 32], strides = [1, 1]} : vector<8x128xf32> to vector<8x32xf32>
    %381 = arith.mulf %374, %320 : vector<8x32xf32>
    %382 = arith.mulf %369, %380 : vector<8x32xf32>
    %383 = arith.addf %381, %382 : vector<8x32xf32>
    %384 = math.tanh %383 : vector<8x32xf32>
    %385 = arith.mulf %379, %384 : vector<8x32xf32>
    %386 = vector.broadcast %5 : vector<1x32xf32> to vector<8x32xf32>
    %387 = arith.mulf %385, %386 : vector<8x32xf32>
    %cst_105 = arith.constant dense<0.000000e+00> : vector<8xf32>
    %388 = vector.multi_reduction <add>, %387, %cst_105 [1] : vector<8x32xf32> to vector<8xf32>
    %389 = vector.shape_cast %388 : vector<8xf32> to vector<8x1xf32>
    %390 = vector.broadcast %6 : vector<1x1xf32> to vector<8x1xf32>
    %391 = arith.addf %389, %390 : vector<8x1xf32>
    %c5_i32 = arith.constant 5 : i32
    %392 = vector.broadcast %c5_i32 : i32 to vector<8x128xi32>
    %393 = arith.cmpi eq, %16, %392 : vector<8x128xi32>
    %394 = vector.shape_cast %391 : vector<8x1xf32> to vector<8x1xf32>
    %395 = vector.broadcast %394 : vector<8x1xf32> to vector<8x128xf32>
    %396 = arith.select %393, %395, %333 : vector<8x128xi1>, vector<8x128xf32>
    %397 = vector.extract_strided_slice %15 {offsets = [6, 0, 0], sizes = [1, 8, 128], strides = [1, 1, 1]} : vector<8x8x128xf32> to vector<1x8x128xf32>
    %398 = vector.shape_cast %397 : vector<1x8x128xf32> to vector<8x128xf32>
    %cst_106 = arith.constant dense<0.000000e+00> : vector<8x128xf32>
    %399 = tpu.matmul %359, %1, %cst_106 {dimension_numbers = #tpu.dot_dimension_numbers<[1], [0], [0], [1], [0, 0, 1, 1], [], []>} : vector<8x32xf32>, vector<32x128xf32>, vector<8x128xf32> -> vector<8x128xf32>
    %400 = arith.addf %398, %399 : vector<8x128xf32>
    %401 = math.tanh %400 : vector<8x128xf32>
    %402 = vector.extract_strided_slice %401 {offsets = [0, 0], sizes = [8, 32], strides = [1, 1]} : vector<8x128xf32> to vector<8x32xf32>
    %cst_107 = arith.constant 5.000000e-01 : f32
    %403 = vector.broadcast %cst_107 : f32 to vector<8x32xf32>
    %404 = arith.mulf %403, %402 : vector<8x32xf32>
    %cst_108 = arith.constant 5.000000e-01 : f32
    %405 = vector.broadcast %cst_108 : f32 to vector<8x32xf32>
    %406 = arith.addf %404, %405 : vector<8x32xf32>
    %407 = vector.extract_strided_slice %401 {offsets = [0, 32], sizes = [8, 32], strides = [1, 1]} : vector<8x128xf32> to vector<8x32xf32>
    %cst_109 = arith.constant 5.000000e-01 : f32
    %408 = vector.broadcast %cst_109 : f32 to vector<8x32xf32>
    %409 = arith.mulf %408, %407 : vector<8x32xf32>
    %cst_110 = arith.constant 5.000000e-01 : f32
    %410 = vector.broadcast %cst_110 : f32 to vector<8x32xf32>
    %411 = arith.addf %409, %410 : vector<8x32xf32>
    %412 = vector.extract_strided_slice %401 {offsets = [0, 64], sizes = [8, 32], strides = [1, 1]} : vector<8x128xf32> to vector<8x32xf32>
    %cst_111 = arith.constant 5.000000e-01 : f32
    %413 = vector.broadcast %cst_111 : f32 to vector<8x32xf32>
    %414 = arith.mulf %413, %412 : vector<8x32xf32>
    %cst_112 = arith.constant 5.000000e-01 : f32
    %415 = vector.broadcast %cst_112 : f32 to vector<8x32xf32>
    %416 = arith.addf %414, %415 : vector<8x32xf32>
    %417 = vector.extract_strided_slice %401 {offsets = [0, 96], sizes = [8, 32], strides = [1, 1]} : vector<8x128xf32> to vector<8x32xf32>
    %418 = arith.mulf %411, %357 : vector<8x32xf32>
    %419 = arith.mulf %406, %417 : vector<8x32xf32>
    %420 = arith.addf %418, %419 : vector<8x32xf32>
    %421 = math.tanh %420 : vector<8x32xf32>
    %422 = arith.mulf %416, %421 : vector<8x32xf32>
    %423 = tpu.concatenate %422, %385 in 1 : vector<8x32xf32>, vector<8x32xf32> -> vector<8x64xf32>
    %cst_113 = arith.constant dense<0.000000e+00> : vector<8x128xf32>
    %424 = tpu.matmul %423, %3, %cst_113 {dimension_numbers = #tpu.dot_dimension_numbers<[1], [0], [0], [1], [0, 0, 1, 1], [], []>} : vector<8x64xf32>, vector<64x128xf32>, vector<8x128xf32> -> vector<8x128xf32>
    %425 = vector.broadcast %4 : vector<1x128xf32> to vector<8x128xf32>
    %426 = arith.addf %424, %425 : vector<8x128xf32>
    %427 = math.tanh %426 : vector<8x128xf32>
    %428 = vector.extract_strided_slice %427 {offsets = [0, 0], sizes = [8, 32], strides = [1, 1]} : vector<8x128xf32> to vector<8x32xf32>
    %cst_114 = arith.constant 5.000000e-01 : f32
    %429 = vector.broadcast %cst_114 : f32 to vector<8x32xf32>
    %430 = arith.mulf %429, %428 : vector<8x32xf32>
    %cst_115 = arith.constant 5.000000e-01 : f32
    %431 = vector.broadcast %cst_115 : f32 to vector<8x32xf32>
    %432 = arith.addf %430, %431 : vector<8x32xf32>
    %433 = vector.extract_strided_slice %427 {offsets = [0, 32], sizes = [8, 32], strides = [1, 1]} : vector<8x128xf32> to vector<8x32xf32>
    %cst_116 = arith.constant 5.000000e-01 : f32
    %434 = vector.broadcast %cst_116 : f32 to vector<8x32xf32>
    %435 = arith.mulf %434, %433 : vector<8x32xf32>
    %cst_117 = arith.constant 5.000000e-01 : f32
    %436 = vector.broadcast %cst_117 : f32 to vector<8x32xf32>
    %437 = arith.addf %435, %436 : vector<8x32xf32>
    %438 = vector.extract_strided_slice %427 {offsets = [0, 64], sizes = [8, 32], strides = [1, 1]} : vector<8x128xf32> to vector<8x32xf32>
    %cst_118 = arith.constant 5.000000e-01 : f32
    %439 = vector.broadcast %cst_118 : f32 to vector<8x32xf32>
    %440 = arith.mulf %439, %438 : vector<8x32xf32>
    %cst_119 = arith.constant 5.000000e-01 : f32
    %441 = vector.broadcast %cst_119 : f32 to vector<8x32xf32>
    %442 = arith.addf %440, %441 : vector<8x32xf32>
    %443 = vector.extract_strided_slice %427 {offsets = [0, 96], sizes = [8, 32], strides = [1, 1]} : vector<8x128xf32> to vector<8x32xf32>
    %444 = arith.mulf %437, %383 : vector<8x32xf32>
    %445 = arith.mulf %432, %443 : vector<8x32xf32>
    %446 = arith.addf %444, %445 : vector<8x32xf32>
    %447 = math.tanh %446 : vector<8x32xf32>
    %448 = arith.mulf %442, %447 : vector<8x32xf32>
    %449 = vector.broadcast %5 : vector<1x32xf32> to vector<8x32xf32>
    %450 = arith.mulf %448, %449 : vector<8x32xf32>
    %cst_120 = arith.constant dense<0.000000e+00> : vector<8xf32>
    %451 = vector.multi_reduction <add>, %450, %cst_120 [1] : vector<8x32xf32> to vector<8xf32>
    %452 = vector.shape_cast %451 : vector<8xf32> to vector<8x1xf32>
    %453 = vector.broadcast %6 : vector<1x1xf32> to vector<8x1xf32>
    %454 = arith.addf %452, %453 : vector<8x1xf32>
    %c6_i32 = arith.constant 6 : i32
    %455 = vector.broadcast %c6_i32 : i32 to vector<8x128xi32>
    %456 = arith.cmpi eq, %16, %455 : vector<8x128xi32>
    %457 = vector.shape_cast %454 : vector<8x1xf32> to vector<8x1xf32>
    %458 = vector.broadcast %457 : vector<8x1xf32> to vector<8x128xf32>
    %459 = arith.select %456, %458, %396 : vector<8x128xi1>, vector<8x128xf32>
    %460 = vector.extract_strided_slice %15 {offsets = [7, 0, 0], sizes = [1, 8, 128], strides = [1, 1, 1]} : vector<8x8x128xf32> to vector<1x8x128xf32>
    %461 = vector.shape_cast %460 : vector<1x8x128xf32> to vector<8x128xf32>
    %cst_121 = arith.constant dense<0.000000e+00> : vector<8x128xf32>
    %462 = tpu.matmul %422, %1, %cst_121 {dimension_numbers = #tpu.dot_dimension_numbers<[1], [0], [0], [1], [0, 0, 1, 1], [], []>} : vector<8x32xf32>, vector<32x128xf32>, vector<8x128xf32> -> vector<8x128xf32>
    %463 = arith.addf %461, %462 : vector<8x128xf32>
    %464 = math.tanh %463 : vector<8x128xf32>
    %465 = vector.extract_strided_slice %464 {offsets = [0, 0], sizes = [8, 32], strides = [1, 1]} : vector<8x128xf32> to vector<8x32xf32>
    %cst_122 = arith.constant 5.000000e-01 : f32
    %466 = vector.broadcast %cst_122 : f32 to vector<8x32xf32>
    %467 = arith.mulf %466, %465 : vector<8x32xf32>
    %cst_123 = arith.constant 5.000000e-01 : f32
    %468 = vector.broadcast %cst_123 : f32 to vector<8x32xf32>
    %469 = arith.addf %467, %468 : vector<8x32xf32>
    %470 = vector.extract_strided_slice %464 {offsets = [0, 32], sizes = [8, 32], strides = [1, 1]} : vector<8x128xf32> to vector<8x32xf32>
    %cst_124 = arith.constant 5.000000e-01 : f32
    %471 = vector.broadcast %cst_124 : f32 to vector<8x32xf32>
    %472 = arith.mulf %471, %470 : vector<8x32xf32>
    %cst_125 = arith.constant 5.000000e-01 : f32
    %473 = vector.broadcast %cst_125 : f32 to vector<8x32xf32>
    %474 = arith.addf %472, %473 : vector<8x32xf32>
    %475 = vector.extract_strided_slice %464 {offsets = [0, 64], sizes = [8, 32], strides = [1, 1]} : vector<8x128xf32> to vector<8x32xf32>
    %cst_126 = arith.constant 5.000000e-01 : f32
    %476 = vector.broadcast %cst_126 : f32 to vector<8x32xf32>
    %477 = arith.mulf %476, %475 : vector<8x32xf32>
    %cst_127 = arith.constant 5.000000e-01 : f32
    %478 = vector.broadcast %cst_127 : f32 to vector<8x32xf32>
    %479 = arith.addf %477, %478 : vector<8x32xf32>
    %480 = vector.extract_strided_slice %464 {offsets = [0, 96], sizes = [8, 32], strides = [1, 1]} : vector<8x128xf32> to vector<8x32xf32>
    %481 = arith.mulf %474, %420 : vector<8x32xf32>
    %482 = arith.mulf %469, %480 : vector<8x32xf32>
    %483 = arith.addf %481, %482 : vector<8x32xf32>
    %484 = math.tanh %483 : vector<8x32xf32>
    %485 = arith.mulf %479, %484 : vector<8x32xf32>
    %486 = tpu.concatenate %485, %448 in 1 : vector<8x32xf32>, vector<8x32xf32> -> vector<8x64xf32>
    %cst_128 = arith.constant dense<0.000000e+00> : vector<8x128xf32>
    %487 = tpu.matmul %486, %3, %cst_128 {dimension_numbers = #tpu.dot_dimension_numbers<[1], [0], [0], [1], [0, 0, 1, 1], [], []>} : vector<8x64xf32>, vector<64x128xf32>, vector<8x128xf32> -> vector<8x128xf32>
    %488 = vector.broadcast %4 : vector<1x128xf32> to vector<8x128xf32>
    %489 = arith.addf %487, %488 : vector<8x128xf32>
    %490 = math.tanh %489 : vector<8x128xf32>
    %491 = vector.extract_strided_slice %490 {offsets = [0, 0], sizes = [8, 32], strides = [1, 1]} : vector<8x128xf32> to vector<8x32xf32>
    %cst_129 = arith.constant 5.000000e-01 : f32
    %492 = vector.broadcast %cst_129 : f32 to vector<8x32xf32>
    %493 = arith.mulf %492, %491 : vector<8x32xf32>
    %cst_130 = arith.constant 5.000000e-01 : f32
    %494 = vector.broadcast %cst_130 : f32 to vector<8x32xf32>
    %495 = arith.addf %493, %494 : vector<8x32xf32>
    %496 = vector.extract_strided_slice %490 {offsets = [0, 32], sizes = [8, 32], strides = [1, 1]} : vector<8x128xf32> to vector<8x32xf32>
    %cst_131 = arith.constant 5.000000e-01 : f32
    %497 = vector.broadcast %cst_131 : f32 to vector<8x32xf32>
    %498 = arith.mulf %497, %496 : vector<8x32xf32>
    %cst_132 = arith.constant 5.000000e-01 : f32
    %499 = vector.broadcast %cst_132 : f32 to vector<8x32xf32>
    %500 = arith.addf %498, %499 : vector<8x32xf32>
    %501 = vector.extract_strided_slice %490 {offsets = [0, 64], sizes = [8, 32], strides = [1, 1]} : vector<8x128xf32> to vector<8x32xf32>
    %cst_133 = arith.constant 5.000000e-01 : f32
    %502 = vector.broadcast %cst_133 : f32 to vector<8x32xf32>
    %503 = arith.mulf %502, %501 : vector<8x32xf32>
    %cst_134 = arith.constant 5.000000e-01 : f32
    %504 = vector.broadcast %cst_134 : f32 to vector<8x32xf32>
    %505 = arith.addf %503, %504 : vector<8x32xf32>
    %506 = vector.extract_strided_slice %490 {offsets = [0, 96], sizes = [8, 32], strides = [1, 1]} : vector<8x128xf32> to vector<8x32xf32>
    %507 = arith.mulf %500, %446 : vector<8x32xf32>
    %508 = arith.mulf %495, %506 : vector<8x32xf32>
    %509 = arith.addf %507, %508 : vector<8x32xf32>
    %510 = math.tanh %509 : vector<8x32xf32>
    %511 = arith.mulf %505, %510 : vector<8x32xf32>
    %512 = vector.broadcast %5 : vector<1x32xf32> to vector<8x32xf32>
    %513 = arith.mulf %511, %512 : vector<8x32xf32>
    %cst_135 = arith.constant dense<0.000000e+00> : vector<8xf32>
    %514 = vector.multi_reduction <add>, %513, %cst_135 [1] : vector<8x32xf32> to vector<8xf32>
    %515 = vector.shape_cast %514 : vector<8xf32> to vector<8x1xf32>
    %516 = vector.broadcast %6 : vector<1x1xf32> to vector<8x1xf32>
    %517 = arith.addf %515, %516 : vector<8x1xf32>
    %c7_i32 = arith.constant 7 : i32
    %518 = vector.broadcast %c7_i32 : i32 to vector<8x128xi32>
    %519 = arith.cmpi eq, %16, %518 : vector<8x128xi32>
    %520 = vector.shape_cast %517 : vector<8x1xf32> to vector<8x1xf32>
    %521 = vector.broadcast %520 : vector<8x1xf32> to vector<8x128xf32>
    %522 = arith.select %519, %521, %459 : vector<8x128xi1>, vector<8x128xf32>
    %523 = vector.broadcast %517 : vector<8x1xf32> to vector<8x128xf32>
    %524 = vector.broadcast %0 : vector<1x128xf32> to vector<8x128xf32>
    %525 = arith.mulf %523, %524 : vector<8x128xf32>
    %526 = vector.broadcast %2 : vector<1x128xf32> to vector<8x128xf32>
    %527 = arith.addf %525, %526 : vector<8x128xf32>
    %cst_136 = arith.constant dense<0.000000e+00> : vector<8x128xf32>
    %528 = tpu.matmul %485, %1, %cst_136 {dimension_numbers = #tpu.dot_dimension_numbers<[1], [0], [0], [1], [0, 0, 1, 1], [], []>} : vector<8x32xf32>, vector<32x128xf32>, vector<8x128xf32> -> vector<8x128xf32>
    %529 = arith.addf %527, %528 : vector<8x128xf32>
    %530 = math.tanh %529 : vector<8x128xf32>
    %531 = vector.extract_strided_slice %530 {offsets = [0, 0], sizes = [8, 32], strides = [1, 1]} : vector<8x128xf32> to vector<8x32xf32>
    %cst_137 = arith.constant 5.000000e-01 : f32
    %532 = vector.broadcast %cst_137 : f32 to vector<8x32xf32>
    %533 = arith.mulf %532, %531 : vector<8x32xf32>
    %cst_138 = arith.constant 5.000000e-01 : f32
    %534 = vector.broadcast %cst_138 : f32 to vector<8x32xf32>
    %535 = arith.addf %533, %534 : vector<8x32xf32>
    %536 = vector.extract_strided_slice %530 {offsets = [0, 32], sizes = [8, 32], strides = [1, 1]} : vector<8x128xf32> to vector<8x32xf32>
    %cst_139 = arith.constant 5.000000e-01 : f32
    %537 = vector.broadcast %cst_139 : f32 to vector<8x32xf32>
    %538 = arith.mulf %537, %536 : vector<8x32xf32>
    %cst_140 = arith.constant 5.000000e-01 : f32
    %539 = vector.broadcast %cst_140 : f32 to vector<8x32xf32>
    %540 = arith.addf %538, %539 : vector<8x32xf32>
    %541 = vector.extract_strided_slice %530 {offsets = [0, 64], sizes = [8, 32], strides = [1, 1]} : vector<8x128xf32> to vector<8x32xf32>
    %cst_141 = arith.constant 5.000000e-01 : f32
    %542 = vector.broadcast %cst_141 : f32 to vector<8x32xf32>
    %543 = arith.mulf %542, %541 : vector<8x32xf32>
    %cst_142 = arith.constant 5.000000e-01 : f32
    %544 = vector.broadcast %cst_142 : f32 to vector<8x32xf32>
    %545 = arith.addf %543, %544 : vector<8x32xf32>
    %546 = vector.extract_strided_slice %530 {offsets = [0, 96], sizes = [8, 32], strides = [1, 1]} : vector<8x128xf32> to vector<8x32xf32>
    %547 = arith.mulf %540, %483 : vector<8x32xf32>
    %548 = arith.mulf %535, %546 : vector<8x32xf32>
    %549 = arith.addf %547, %548 : vector<8x32xf32>
    %550 = math.tanh %549 : vector<8x32xf32>
    %551 = arith.mulf %545, %550 : vector<8x32xf32>
    %552 = tpu.concatenate %551, %511 in 1 : vector<8x32xf32>, vector<8x32xf32> -> vector<8x64xf32>
    %cst_143 = arith.constant dense<0.000000e+00> : vector<8x128xf32>
    %553 = tpu.matmul %552, %3, %cst_143 {dimension_numbers = #tpu.dot_dimension_numbers<[1], [0], [0], [1], [0, 0, 1, 1], [], []>} : vector<8x64xf32>, vector<64x128xf32>, vector<8x128xf32> -> vector<8x128xf32>
    %554 = vector.broadcast %4 : vector<1x128xf32> to vector<8x128xf32>
    %555 = arith.addf %553, %554 : vector<8x128xf32>
    %556 = math.tanh %555 : vector<8x128xf32>
    %557 = vector.extract_strided_slice %556 {offsets = [0, 0], sizes = [8, 32], strides = [1, 1]} : vector<8x128xf32> to vector<8x32xf32>
    %cst_144 = arith.constant 5.000000e-01 : f32
    %558 = vector.broadcast %cst_144 : f32 to vector<8x32xf32>
    %559 = arith.mulf %558, %557 : vector<8x32xf32>
    %cst_145 = arith.constant 5.000000e-01 : f32
    %560 = vector.broadcast %cst_145 : f32 to vector<8x32xf32>
    %561 = arith.addf %559, %560 : vector<8x32xf32>
    %562 = vector.extract_strided_slice %556 {offsets = [0, 32], sizes = [8, 32], strides = [1, 1]} : vector<8x128xf32> to vector<8x32xf32>
    %cst_146 = arith.constant 5.000000e-01 : f32
    %563 = vector.broadcast %cst_146 : f32 to vector<8x32xf32>
    %564 = arith.mulf %563, %562 : vector<8x32xf32>
    %cst_147 = arith.constant 5.000000e-01 : f32
    %565 = vector.broadcast %cst_147 : f32 to vector<8x32xf32>
    %566 = arith.addf %564, %565 : vector<8x32xf32>
    %567 = vector.extract_strided_slice %556 {offsets = [0, 64], sizes = [8, 32], strides = [1, 1]} : vector<8x128xf32> to vector<8x32xf32>
    %cst_148 = arith.constant 5.000000e-01 : f32
    %568 = vector.broadcast %cst_148 : f32 to vector<8x32xf32>
    %569 = arith.mulf %568, %567 : vector<8x32xf32>
    %cst_149 = arith.constant 5.000000e-01 : f32
    %570 = vector.broadcast %cst_149 : f32 to vector<8x32xf32>
    %571 = arith.addf %569, %570 : vector<8x32xf32>
    %572 = vector.extract_strided_slice %556 {offsets = [0, 96], sizes = [8, 32], strides = [1, 1]} : vector<8x128xf32> to vector<8x32xf32>
    %573 = arith.mulf %566, %509 : vector<8x32xf32>
    %574 = arith.mulf %561, %572 : vector<8x32xf32>
    %575 = arith.addf %573, %574 : vector<8x32xf32>
    %576 = math.tanh %575 : vector<8x32xf32>
    %577 = arith.mulf %571, %576 : vector<8x32xf32>
    %578 = vector.broadcast %5 : vector<1x32xf32> to vector<8x32xf32>
    %579 = arith.mulf %577, %578 : vector<8x32xf32>
    %cst_150 = arith.constant dense<0.000000e+00> : vector<8xf32>
    %580 = vector.multi_reduction <add>, %579, %cst_150 [1] : vector<8x32xf32> to vector<8xf32>
    %581 = vector.shape_cast %580 : vector<8xf32> to vector<8x1xf32>
    %582 = vector.broadcast %6 : vector<1x1xf32> to vector<8x1xf32>
    %583 = arith.addf %581, %582 : vector<8x1xf32>
    %c8_i32 = arith.constant 8 : i32
    %584 = vector.broadcast %c8_i32 : i32 to vector<8x128xi32>
    %585 = arith.cmpi eq, %16, %584 : vector<8x128xi32>
    %586 = vector.shape_cast %583 : vector<8x1xf32> to vector<8x1xf32>
    %587 = vector.broadcast %586 : vector<8x1xf32> to vector<8x128xf32>
    %588 = arith.select %585, %587, %522 : vector<8x128xi1>, vector<8x128xf32>
    %589 = vector.broadcast %583 : vector<8x1xf32> to vector<8x128xf32>
    %590 = vector.broadcast %0 : vector<1x128xf32> to vector<8x128xf32>
    %591 = arith.mulf %589, %590 : vector<8x128xf32>
    %592 = vector.broadcast %2 : vector<1x128xf32> to vector<8x128xf32>
    %593 = arith.addf %591, %592 : vector<8x128xf32>
    %cst_151 = arith.constant dense<0.000000e+00> : vector<8x128xf32>
    %594 = tpu.matmul %551, %1, %cst_151 {dimension_numbers = #tpu.dot_dimension_numbers<[1], [0], [0], [1], [0, 0, 1, 1], [], []>} : vector<8x32xf32>, vector<32x128xf32>, vector<8x128xf32> -> vector<8x128xf32>
    %595 = arith.addf %593, %594 : vector<8x128xf32>
    %596 = math.tanh %595 : vector<8x128xf32>
    %597 = vector.extract_strided_slice %596 {offsets = [0, 0], sizes = [8, 32], strides = [1, 1]} : vector<8x128xf32> to vector<8x32xf32>
    %cst_152 = arith.constant 5.000000e-01 : f32
    %598 = vector.broadcast %cst_152 : f32 to vector<8x32xf32>
    %599 = arith.mulf %598, %597 : vector<8x32xf32>
    %cst_153 = arith.constant 5.000000e-01 : f32
    %600 = vector.broadcast %cst_153 : f32 to vector<8x32xf32>
    %601 = arith.addf %599, %600 : vector<8x32xf32>
    %602 = vector.extract_strided_slice %596 {offsets = [0, 32], sizes = [8, 32], strides = [1, 1]} : vector<8x128xf32> to vector<8x32xf32>
    %cst_154 = arith.constant 5.000000e-01 : f32
    %603 = vector.broadcast %cst_154 : f32 to vector<8x32xf32>
    %604 = arith.mulf %603, %602 : vector<8x32xf32>
    %cst_155 = arith.constant 5.000000e-01 : f32
    %605 = vector.broadcast %cst_155 : f32 to vector<8x32xf32>
    %606 = arith.addf %604, %605 : vector<8x32xf32>
    %607 = vector.extract_strided_slice %596 {offsets = [0, 64], sizes = [8, 32], strides = [1, 1]} : vector<8x128xf32> to vector<8x32xf32>
    %cst_156 = arith.constant 5.000000e-01 : f32
    %608 = vector.broadcast %cst_156 : f32 to vector<8x32xf32>
    %609 = arith.mulf %608, %607 : vector<8x32xf32>
    %cst_157 = arith.constant 5.000000e-01 : f32
    %610 = vector.broadcast %cst_157 : f32 to vector<8x32xf32>
    %611 = arith.addf %609, %610 : vector<8x32xf32>
    %612 = vector.extract_strided_slice %596 {offsets = [0, 96], sizes = [8, 32], strides = [1, 1]} : vector<8x128xf32> to vector<8x32xf32>
    %613 = arith.mulf %606, %549 : vector<8x32xf32>
    %614 = arith.mulf %601, %612 : vector<8x32xf32>
    %615 = arith.addf %613, %614 : vector<8x32xf32>
    %616 = math.tanh %615 : vector<8x32xf32>
    %617 = arith.mulf %611, %616 : vector<8x32xf32>
    %618 = tpu.concatenate %617, %577 in 1 : vector<8x32xf32>, vector<8x32xf32> -> vector<8x64xf32>
    %cst_158 = arith.constant dense<0.000000e+00> : vector<8x128xf32>
    %619 = tpu.matmul %618, %3, %cst_158 {dimension_numbers = #tpu.dot_dimension_numbers<[1], [0], [0], [1], [0, 0, 1, 1], [], []>} : vector<8x64xf32>, vector<64x128xf32>, vector<8x128xf32> -> vector<8x128xf32>
    %620 = vector.broadcast %4 : vector<1x128xf32> to vector<8x128xf32>
    %621 = arith.addf %619, %620 : vector<8x128xf32>
    %622 = math.tanh %621 : vector<8x128xf32>
    %623 = vector.extract_strided_slice %622 {offsets = [0, 0], sizes = [8, 32], strides = [1, 1]} : vector<8x128xf32> to vector<8x32xf32>
    %cst_159 = arith.constant 5.000000e-01 : f32
    %624 = vector.broadcast %cst_159 : f32 to vector<8x32xf32>
    %625 = arith.mulf %624, %623 : vector<8x32xf32>
    %cst_160 = arith.constant 5.000000e-01 : f32
    %626 = vector.broadcast %cst_160 : f32 to vector<8x32xf32>
    %627 = arith.addf %625, %626 : vector<8x32xf32>
    %628 = vector.extract_strided_slice %622 {offsets = [0, 32], sizes = [8, 32], strides = [1, 1]} : vector<8x128xf32> to vector<8x32xf32>
    %cst_161 = arith.constant 5.000000e-01 : f32
    %629 = vector.broadcast %cst_161 : f32 to vector<8x32xf32>
    %630 = arith.mulf %629, %628 : vector<8x32xf32>
    %cst_162 = arith.constant 5.000000e-01 : f32
    %631 = vector.broadcast %cst_162 : f32 to vector<8x32xf32>
    %632 = arith.addf %630, %631 : vector<8x32xf32>
    %633 = vector.extract_strided_slice %622 {offsets = [0, 64], sizes = [8, 32], strides = [1, 1]} : vector<8x128xf32> to vector<8x32xf32>
    %cst_163 = arith.constant 5.000000e-01 : f32
    %634 = vector.broadcast %cst_163 : f32 to vector<8x32xf32>
    %635 = arith.mulf %634, %633 : vector<8x32xf32>
    %cst_164 = arith.constant 5.000000e-01 : f32
    %636 = vector.broadcast %cst_164 : f32 to vector<8x32xf32>
    %637 = arith.addf %635, %636 : vector<8x32xf32>
    %638 = vector.extract_strided_slice %622 {offsets = [0, 96], sizes = [8, 32], strides = [1, 1]} : vector<8x128xf32> to vector<8x32xf32>
    %639 = arith.mulf %632, %575 : vector<8x32xf32>
    %640 = arith.mulf %627, %638 : vector<8x32xf32>
    %641 = arith.addf %639, %640 : vector<8x32xf32>
    %642 = math.tanh %641 : vector<8x32xf32>
    %643 = arith.mulf %637, %642 : vector<8x32xf32>
    %644 = vector.broadcast %5 : vector<1x32xf32> to vector<8x32xf32>
    %645 = arith.mulf %643, %644 : vector<8x32xf32>
    %cst_165 = arith.constant dense<0.000000e+00> : vector<8xf32>
    %646 = vector.multi_reduction <add>, %645, %cst_165 [1] : vector<8x32xf32> to vector<8xf32>
    %647 = vector.shape_cast %646 : vector<8xf32> to vector<8x1xf32>
    %648 = vector.broadcast %6 : vector<1x1xf32> to vector<8x1xf32>
    %649 = arith.addf %647, %648 : vector<8x1xf32>
    %c9_i32 = arith.constant 9 : i32
    %650 = vector.broadcast %c9_i32 : i32 to vector<8x128xi32>
    %651 = arith.cmpi eq, %16, %650 : vector<8x128xi32>
    %652 = vector.shape_cast %649 : vector<8x1xf32> to vector<8x1xf32>
    %653 = vector.broadcast %652 : vector<8x1xf32> to vector<8x128xf32>
    %654 = arith.select %651, %653, %588 : vector<8x128xi1>, vector<8x128xf32>
    %655 = vector.broadcast %649 : vector<8x1xf32> to vector<8x128xf32>
    %656 = vector.broadcast %0 : vector<1x128xf32> to vector<8x128xf32>
    %657 = arith.mulf %655, %656 : vector<8x128xf32>
    %658 = vector.broadcast %2 : vector<1x128xf32> to vector<8x128xf32>
    %659 = arith.addf %657, %658 : vector<8x128xf32>
    %cst_166 = arith.constant dense<0.000000e+00> : vector<8x128xf32>
    %660 = tpu.matmul %617, %1, %cst_166 {dimension_numbers = #tpu.dot_dimension_numbers<[1], [0], [0], [1], [0, 0, 1, 1], [], []>} : vector<8x32xf32>, vector<32x128xf32>, vector<8x128xf32> -> vector<8x128xf32>
    %661 = arith.addf %659, %660 : vector<8x128xf32>
    %662 = math.tanh %661 : vector<8x128xf32>
    %663 = vector.extract_strided_slice %662 {offsets = [0, 0], sizes = [8, 32], strides = [1, 1]} : vector<8x128xf32> to vector<8x32xf32>
    %cst_167 = arith.constant 5.000000e-01 : f32
    %664 = vector.broadcast %cst_167 : f32 to vector<8x32xf32>
    %665 = arith.mulf %664, %663 : vector<8x32xf32>
    %cst_168 = arith.constant 5.000000e-01 : f32
    %666 = vector.broadcast %cst_168 : f32 to vector<8x32xf32>
    %667 = arith.addf %665, %666 : vector<8x32xf32>
    %668 = vector.extract_strided_slice %662 {offsets = [0, 32], sizes = [8, 32], strides = [1, 1]} : vector<8x128xf32> to vector<8x32xf32>
    %cst_169 = arith.constant 5.000000e-01 : f32
    %669 = vector.broadcast %cst_169 : f32 to vector<8x32xf32>
    %670 = arith.mulf %669, %668 : vector<8x32xf32>
    %cst_170 = arith.constant 5.000000e-01 : f32
    %671 = vector.broadcast %cst_170 : f32 to vector<8x32xf32>
    %672 = arith.addf %670, %671 : vector<8x32xf32>
    %673 = vector.extract_strided_slice %662 {offsets = [0, 64], sizes = [8, 32], strides = [1, 1]} : vector<8x128xf32> to vector<8x32xf32>
    %cst_171 = arith.constant 5.000000e-01 : f32
    %674 = vector.broadcast %cst_171 : f32 to vector<8x32xf32>
    %675 = arith.mulf %674, %673 : vector<8x32xf32>
    %cst_172 = arith.constant 5.000000e-01 : f32
    %676 = vector.broadcast %cst_172 : f32 to vector<8x32xf32>
    %677 = arith.addf %675, %676 : vector<8x32xf32>
    %678 = vector.extract_strided_slice %662 {offsets = [0, 96], sizes = [8, 32], strides = [1, 1]} : vector<8x128xf32> to vector<8x32xf32>
    %679 = arith.mulf %672, %615 : vector<8x32xf32>
    %680 = arith.mulf %667, %678 : vector<8x32xf32>
    %681 = arith.addf %679, %680 : vector<8x32xf32>
    %682 = math.tanh %681 : vector<8x32xf32>
    %683 = arith.mulf %677, %682 : vector<8x32xf32>
    %684 = tpu.concatenate %683, %643 in 1 : vector<8x32xf32>, vector<8x32xf32> -> vector<8x64xf32>
    %cst_173 = arith.constant dense<0.000000e+00> : vector<8x128xf32>
    %685 = tpu.matmul %684, %3, %cst_173 {dimension_numbers = #tpu.dot_dimension_numbers<[1], [0], [0], [1], [0, 0, 1, 1], [], []>} : vector<8x64xf32>, vector<64x128xf32>, vector<8x128xf32> -> vector<8x128xf32>
    %686 = vector.broadcast %4 : vector<1x128xf32> to vector<8x128xf32>
    %687 = arith.addf %685, %686 : vector<8x128xf32>
    %688 = math.tanh %687 : vector<8x128xf32>
    %689 = vector.extract_strided_slice %688 {offsets = [0, 0], sizes = [8, 32], strides = [1, 1]} : vector<8x128xf32> to vector<8x32xf32>
    %cst_174 = arith.constant 5.000000e-01 : f32
    %690 = vector.broadcast %cst_174 : f32 to vector<8x32xf32>
    %691 = arith.mulf %690, %689 : vector<8x32xf32>
    %cst_175 = arith.constant 5.000000e-01 : f32
    %692 = vector.broadcast %cst_175 : f32 to vector<8x32xf32>
    %693 = arith.addf %691, %692 : vector<8x32xf32>
    %694 = vector.extract_strided_slice %688 {offsets = [0, 32], sizes = [8, 32], strides = [1, 1]} : vector<8x128xf32> to vector<8x32xf32>
    %cst_176 = arith.constant 5.000000e-01 : f32
    %695 = vector.broadcast %cst_176 : f32 to vector<8x32xf32>
    %696 = arith.mulf %695, %694 : vector<8x32xf32>
    %cst_177 = arith.constant 5.000000e-01 : f32
    %697 = vector.broadcast %cst_177 : f32 to vector<8x32xf32>
    %698 = arith.addf %696, %697 : vector<8x32xf32>
    %699 = vector.extract_strided_slice %688 {offsets = [0, 64], sizes = [8, 32], strides = [1, 1]} : vector<8x128xf32> to vector<8x32xf32>
    %cst_178 = arith.constant 5.000000e-01 : f32
    %700 = vector.broadcast %cst_178 : f32 to vector<8x32xf32>
    %701 = arith.mulf %700, %699 : vector<8x32xf32>
    %cst_179 = arith.constant 5.000000e-01 : f32
    %702 = vector.broadcast %cst_179 : f32 to vector<8x32xf32>
    %703 = arith.addf %701, %702 : vector<8x32xf32>
    %704 = vector.extract_strided_slice %688 {offsets = [0, 96], sizes = [8, 32], strides = [1, 1]} : vector<8x128xf32> to vector<8x32xf32>
    %705 = arith.mulf %698, %641 : vector<8x32xf32>
    %706 = arith.mulf %693, %704 : vector<8x32xf32>
    %707 = arith.addf %705, %706 : vector<8x32xf32>
    %708 = math.tanh %707 : vector<8x32xf32>
    %709 = arith.mulf %703, %708 : vector<8x32xf32>
    %710 = vector.broadcast %5 : vector<1x32xf32> to vector<8x32xf32>
    %711 = arith.mulf %709, %710 : vector<8x32xf32>
    %cst_180 = arith.constant dense<0.000000e+00> : vector<8xf32>
    %712 = vector.multi_reduction <add>, %711, %cst_180 [1] : vector<8x32xf32> to vector<8xf32>
    %713 = vector.shape_cast %712 : vector<8xf32> to vector<8x1xf32>
    %714 = vector.broadcast %6 : vector<1x1xf32> to vector<8x1xf32>
    %715 = arith.addf %713, %714 : vector<8x1xf32>
    %c10_i32 = arith.constant 10 : i32
    %716 = vector.broadcast %c10_i32 : i32 to vector<8x128xi32>
    %717 = arith.cmpi eq, %16, %716 : vector<8x128xi32>
    %718 = vector.shape_cast %715 : vector<8x1xf32> to vector<8x1xf32>
    %719 = vector.broadcast %718 : vector<8x1xf32> to vector<8x128xf32>
    %720 = arith.select %717, %719, %654 : vector<8x128xi1>, vector<8x128xf32>
    %721 = vector.broadcast %715 : vector<8x1xf32> to vector<8x128xf32>
    %722 = vector.broadcast %0 : vector<1x128xf32> to vector<8x128xf32>
    %723 = arith.mulf %721, %722 : vector<8x128xf32>
    %724 = vector.broadcast %2 : vector<1x128xf32> to vector<8x128xf32>
    %725 = arith.addf %723, %724 : vector<8x128xf32>
    %cst_181 = arith.constant dense<0.000000e+00> : vector<8x128xf32>
    %726 = tpu.matmul %683, %1, %cst_181 {dimension_numbers = #tpu.dot_dimension_numbers<[1], [0], [0], [1], [0, 0, 1, 1], [], []>} : vector<8x32xf32>, vector<32x128xf32>, vector<8x128xf32> -> vector<8x128xf32>
    %727 = arith.addf %725, %726 : vector<8x128xf32>
    %728 = math.tanh %727 : vector<8x128xf32>
    %729 = vector.extract_strided_slice %728 {offsets = [0, 0], sizes = [8, 32], strides = [1, 1]} : vector<8x128xf32> to vector<8x32xf32>
    %cst_182 = arith.constant 5.000000e-01 : f32
    %730 = vector.broadcast %cst_182 : f32 to vector<8x32xf32>
    %731 = arith.mulf %730, %729 : vector<8x32xf32>
    %cst_183 = arith.constant 5.000000e-01 : f32
    %732 = vector.broadcast %cst_183 : f32 to vector<8x32xf32>
    %733 = arith.addf %731, %732 : vector<8x32xf32>
    %734 = vector.extract_strided_slice %728 {offsets = [0, 32], sizes = [8, 32], strides = [1, 1]} : vector<8x128xf32> to vector<8x32xf32>
    %cst_184 = arith.constant 5.000000e-01 : f32
    %735 = vector.broadcast %cst_184 : f32 to vector<8x32xf32>
    %736 = arith.mulf %735, %734 : vector<8x32xf32>
    %cst_185 = arith.constant 5.000000e-01 : f32
    %737 = vector.broadcast %cst_185 : f32 to vector<8x32xf32>
    %738 = arith.addf %736, %737 : vector<8x32xf32>
    %739 = vector.extract_strided_slice %728 {offsets = [0, 64], sizes = [8, 32], strides = [1, 1]} : vector<8x128xf32> to vector<8x32xf32>
    %cst_186 = arith.constant 5.000000e-01 : f32
    %740 = vector.broadcast %cst_186 : f32 to vector<8x32xf32>
    %741 = arith.mulf %740, %739 : vector<8x32xf32>
    %cst_187 = arith.constant 5.000000e-01 : f32
    %742 = vector.broadcast %cst_187 : f32 to vector<8x32xf32>
    %743 = arith.addf %741, %742 : vector<8x32xf32>
    %744 = vector.extract_strided_slice %728 {offsets = [0, 96], sizes = [8, 32], strides = [1, 1]} : vector<8x128xf32> to vector<8x32xf32>
    %745 = arith.mulf %738, %681 : vector<8x32xf32>
    %746 = arith.mulf %733, %744 : vector<8x32xf32>
    %747 = arith.addf %745, %746 : vector<8x32xf32>
    %748 = math.tanh %747 : vector<8x32xf32>
    %749 = arith.mulf %743, %748 : vector<8x32xf32>
    %750 = tpu.concatenate %749, %709 in 1 : vector<8x32xf32>, vector<8x32xf32> -> vector<8x64xf32>
    %cst_188 = arith.constant dense<0.000000e+00> : vector<8x128xf32>
    %751 = tpu.matmul %750, %3, %cst_188 {dimension_numbers = #tpu.dot_dimension_numbers<[1], [0], [0], [1], [0, 0, 1, 1], [], []>} : vector<8x64xf32>, vector<64x128xf32>, vector<8x128xf32> -> vector<8x128xf32>
    %752 = vector.broadcast %4 : vector<1x128xf32> to vector<8x128xf32>
    %753 = arith.addf %751, %752 : vector<8x128xf32>
    %754 = math.tanh %753 : vector<8x128xf32>
    %755 = vector.extract_strided_slice %754 {offsets = [0, 0], sizes = [8, 32], strides = [1, 1]} : vector<8x128xf32> to vector<8x32xf32>
    %cst_189 = arith.constant 5.000000e-01 : f32
    %756 = vector.broadcast %cst_189 : f32 to vector<8x32xf32>
    %757 = arith.mulf %756, %755 : vector<8x32xf32>
    %cst_190 = arith.constant 5.000000e-01 : f32
    %758 = vector.broadcast %cst_190 : f32 to vector<8x32xf32>
    %759 = arith.addf %757, %758 : vector<8x32xf32>
    %760 = vector.extract_strided_slice %754 {offsets = [0, 32], sizes = [8, 32], strides = [1, 1]} : vector<8x128xf32> to vector<8x32xf32>
    %cst_191 = arith.constant 5.000000e-01 : f32
    %761 = vector.broadcast %cst_191 : f32 to vector<8x32xf32>
    %762 = arith.mulf %761, %760 : vector<8x32xf32>
    %cst_192 = arith.constant 5.000000e-01 : f32
    %763 = vector.broadcast %cst_192 : f32 to vector<8x32xf32>
    %764 = arith.addf %762, %763 : vector<8x32xf32>
    %765 = vector.extract_strided_slice %754 {offsets = [0, 64], sizes = [8, 32], strides = [1, 1]} : vector<8x128xf32> to vector<8x32xf32>
    %cst_193 = arith.constant 5.000000e-01 : f32
    %766 = vector.broadcast %cst_193 : f32 to vector<8x32xf32>
    %767 = arith.mulf %766, %765 : vector<8x32xf32>
    %cst_194 = arith.constant 5.000000e-01 : f32
    %768 = vector.broadcast %cst_194 : f32 to vector<8x32xf32>
    %769 = arith.addf %767, %768 : vector<8x32xf32>
    %770 = vector.extract_strided_slice %754 {offsets = [0, 96], sizes = [8, 32], strides = [1, 1]} : vector<8x128xf32> to vector<8x32xf32>
    %771 = arith.mulf %764, %707 : vector<8x32xf32>
    %772 = arith.mulf %759, %770 : vector<8x32xf32>
    %773 = arith.addf %771, %772 : vector<8x32xf32>
    %774 = math.tanh %773 : vector<8x32xf32>
    %775 = arith.mulf %769, %774 : vector<8x32xf32>
    %776 = vector.broadcast %5 : vector<1x32xf32> to vector<8x32xf32>
    %777 = arith.mulf %775, %776 : vector<8x32xf32>
    %cst_195 = arith.constant dense<0.000000e+00> : vector<8xf32>
    %778 = vector.multi_reduction <add>, %777, %cst_195 [1] : vector<8x32xf32> to vector<8xf32>
    %779 = vector.shape_cast %778 : vector<8xf32> to vector<8x1xf32>
    %780 = vector.broadcast %6 : vector<1x1xf32> to vector<8x1xf32>
    %781 = arith.addf %779, %780 : vector<8x1xf32>
    %c11_i32 = arith.constant 11 : i32
    %782 = vector.broadcast %c11_i32 : i32 to vector<8x128xi32>
    %783 = arith.cmpi eq, %16, %782 : vector<8x128xi32>
    %784 = vector.shape_cast %781 : vector<8x1xf32> to vector<8x1xf32>
    %785 = vector.broadcast %784 : vector<8x1xf32> to vector<8x128xf32>
    %786 = arith.select %783, %785, %720 : vector<8x128xi1>, vector<8x128xf32>
    %c0_196 = arith.constant 0 : index
    %c0_197 = arith.constant 0 : index
    %787 = vector.load %arg8[%c0_196, %c0_197] : memref<8x128xf32, #tpu.memory_space<vmem>>, vector<8x128xf32>
    tpu.vector_store %arg8[%c0_196, %c0_197], %786 {strides = array<i32>} : memref<8x128xf32, #tpu.memory_space<vmem>>, vector<8x128xf32>,
    return
  }
}

</mosaic_0001>

<bundles_post_ra>
// kernel: tpu_custom_call.1
= control target key start
LH: loop header
LB: loop body
LE: loop exit
PB: predicated region body
PF: predicated region fallthrough
CT: control target
= control target key end

     0   :  { %s4455_s0 = inlined_call_operand.hbm [shape: f32[8,8], index: 0, kind: input, shape index: {}]   ;;  %s4456_s1 = inlined_call_operand.vmem [shape: f32[1,128], index: 1, kind: input, shape index: {}]   ;;  %s4457_s2 = inlined_call_operand.hbm [shape: f32[32,128], index: 2, kind: input, shape index: {}]   ;;  %s4458_s3 = inlined_call_operand.vmem [shape: f32[1,128], index: 3, kind: input, shape index: {}]   ;;  %s4459_s4 = inlined_call_operand.hbm [shape: f32[64,128], index: 4, kind: input, shape index: {}]   ;;  %s4460_s5 = inlined_call_operand.vmem [shape: f32[1,128], index: 5, kind: input, shape index: {}]   ;;  %s4461_s6 = inlined_call_operand.vmem [shape: f32[1,32], index: 6, kind: input, shape index: {}]   ;;  %s4462_s7 = inlined_call_operand.<no memory space> [shape: f32[1,1], index: 7, kind: input, shape index: {}]   ;;  %s4463_s8 = inlined_call_operand.hbm [shape: f32[8,128], index: 8, kind: output, shape index: {}]  }
   0x1   :  { %v13_v0 = vstv %s4462_s7 }
   0x2   :  { %14 = vst [vmem:[#allocation2] sm:$0x1] %v13_v0 }
   0x3   :  { %15 = vsyncpa [#allocation4], 0 }
   0x4   :  { %16 = vsyncpa [#allocation7], 0 }
   0x5   :  { %17 = vsyncpa [#allocation5], 0  ;;  %s3731_s29 = smov [#allocation6]   ;;  %s3637_s11 = scalar_lea.hbm %s4457_s2, 512 }
   0x6   :  { %s35_s30 = sshll.u32 %s3731_s29, 4  ;;  %p3638_p0 = scmp.ne.s32.totalorder %s4457_s2, %s3637_s11  ;;  %s36_s30 = int_to_ptr.vmem [resolvable:$true] %s35_s30 }
   0x7   :  { %p3641_p1 = scmp.lt.u32.totalorder %s3637_s11, %s4457_s2 }
   0x9   :  { %p3643_p2 = pnand %p3641_p1, %p3638_p0 }
   0xb   :  { %3646 = shalt.err (!%p3643_p2)
}
   0xc   :  { %s3647_s7 = scalar_lea.vmem %s36_s30, 512  ;;  %p3652_p4 = scmp.lt.s32.totalorder %s36_s30, %s36_s30 }
   0xd   :  { %p3648_p3 = scmp.ne.s32.totalorder %s36_s30, %s3647_s7  ;;  %p3653_p5 = scmp.lt.s32.totalorder %s3647_s7, %s3647_s7 }
   0xf   :  { %p3654_p6 = por %p3653_p5, %p3652_p4 }
  0x11   :  { %p3655_p7 = pnand %p3654_p6, %p3648_p3 }
  0x13   :  { %3658 = shalt.err (!%p3655_p7)
}
  0x14   :  { %s3732_s16 = smov 128   ;;  %s3733_s17 = smov 8  }
  0x15   :  { %41 = dma.hbm_to_vmem [thread:$0]  %s4457_s2, 512, %s36_s30, [#allocation7], %s3732_s16, %s3732_s16, %s3733_s17  }
  0x16   :  { %s3734_s20 = smov [#allocation3]   ;;  %s3735_s22 = smov [#allocation8]  }
  0x17   :  { %s24_s21 = sshll.u32 %s3734_s20, 4  ;;  %s49_s23 = sshll.u32 %s3735_s22, 4  ;;  %s25_s21 = int_to_ptr.vmem [resolvable:$true] %s24_s21  ;;  %s50_s23 = int_to_ptr.vmem [resolvable:$true] %s49_s23 }
  0x18   :  { %s3659_s26 = scalar_lea.hbm %s4455_s0, 128 }
  0x19   :  { %p3660_p8 = scmp.ne.s32.totalorder %s4455_s0, %s3659_s26  ;;  %p3663_p9 = scmp.lt.u32.totalorder %s3659_s26, %s4455_s0 }
  0x1b   :  { %p3665_p10 = pnand %p3663_p9, %p3660_p8 }
  0x1d   :  { %3668 = shalt.err (!%p3665_p10)
}
  0x1e   :  { %s3669_s2 = scalar_lea.vmem %s25_s21, 128  ;;  %p3674_p12 = scmp.lt.s32.totalorder %s25_s21, %s25_s21 }
  0x1f   :  { %p3670_p11 = scmp.ne.s32.totalorder %s25_s21, %s3669_s2  ;;  %p3675_p13 = scmp.lt.s32.totalorder %s3669_s2, %s3669_s2 }
  0x21   :  { %p3676_p0 = por %p3675_p13, %p3674_p12 }
  0x23   :  { %p3677_p1 = pnand %p3676_p0, %p3670_p11 }
  0x25   :  { %3680 = shalt.err (!%p3677_p1)
}
  0x26   :  { %27 = dma.hbm_to_vmem [thread:$0]  %s4455_s0, 128, %s25_s21, [#allocation4]  }
  0x27   :  { %s3681_s13 = scalar_lea.hbm %s4459_s4, 1024 }
  0x28   :  { %p3682_p2 = scmp.ne.s32.totalorder %s4459_s4, %s3681_s13  ;;  %p3685_p3 = scmp.lt.u32.totalorder %s3681_s13, %s4459_s4 }
  0x2a   :  { %p3687_p4 = pnand %p3685_p3, %p3682_p2 }
  0x2c   :  { %3690 = shalt.err (!%p3687_p4)
}
  0x2d   :  { %s3691_s19 = scalar_lea.vmem %s50_s23, 1024  ;;  %p3696_p6 = scmp.lt.s32.totalorder %s50_s23, %s50_s23 }
  0x2e   :  { %p3692_p5 = scmp.ne.s32.totalorder %s50_s23, %s3691_s19  ;;  %p3697_p7 = scmp.lt.s32.totalorder %s3691_s19, %s3691_s19 }
  0x30   :  { %p3698_p8 = por %p3697_p7, %p3696_p6 }
  0x32   :  { %p3699_p9 = pnand %p3698_p8, %p3692_p5 }
  0x34   :  { %3702 = shalt.err (!%p3699_p9)
}
  0x35   :  { %55 = dma.hbm_to_vmem [thread:$0]  %s4459_s4, 1024, %s50_s23, [#allocation7], %s3732_s16, %s3732_s16, %s3733_s17  }
  0x36   :  { %3725 = dma.done.wait [#allocation4], 128  }
  0x37   :  { %3726 = vsyncadd [#allocation4], 4294967168 }
  0x38   :  { %3727 = dma.done.wait [#allocation7], 1536  }
  0x39   :  { %3728 = vsyncadd [#allocation7], 4294965760  ;;  %v89_v1 = vlaneseq  ;;  %v3736_v2 = vmov 0.0|0.0   ;;  %vm3737_vm0 = vmmov 0   ;;  %v3738_v3 = vmov 0.0   ;;  %v72_v6 = vld [vmem:[#allocation6] sm:$0xff] }
  0x3a   :  { %3307 = vmatprep.subr.bf16.mxu1 %v3736_v2  ;;  %2955 = vmatprep.mubr.msk.f32.mxu1 %vm3737_vm0, %v3738_v3  ;;  %v73_v7 = vld [vmem:[#allocation6 + $0x8] sm:$0xff]  ;;  %v74_v8 = vld [vmem:[#allocation6 + $0x10] sm:$0xff]  ;;  %v75_v10 = vld [vmem:[#allocation6 + $0x18] sm:$0xff]  ;;  %s3739_s22 = smov 32   ;;  %s3740_s23 = smov 64   ;;  %vm175_vm1 = vcmask 261120  }
  0x3b   :  { %v3838_v4 = vshrl.u32 %v89_v1, 7  ;;  %3325 = vmatprep.subr.bf16.mxu0 %v3736_v2  ;;  %2985 = vmatprep.mubr.msk.f32.mxu0 %vm3737_vm0, %v3738_v3  ;;  %v3844_v9 = vpack.c.bf16 %v73_v7, %v72_v6  ;;  %v3846_v11 = vld [vmem:[#allocation3] sm:$0xff]  ;;  %v3850_v13 = vpack.c.bf16 %v75_v10, %v74_v8  ;;  %v3865_v15 = vld [vmem:[%s4456_s1] ss:$0 sm:$0xff]  ;;  %v77_v30 = vld [vmem:[#allocation8] sm:$0xff]  ;;  %vm281_vm2 = vcmask 523264  }
  0x3c   :  { %v3871_v17 = vld [vmem:[%s4458_s3] ss:$0 sm:$0xff]  ;;  %v78_v31 = vld [vmem:[#allocation8 + $0x8] sm:$0xff]  ;;  %v80_v34 = vld [vmem:[#allocation8 + $0x18] sm:$0xff]  ;;  %s3741_s26 = smov 96  }
  0x3d   :  { %v91_v5 = vsub.s32 0, %v3838_v4  ;;  %3309 = vmatpush3.bf16.msra.mxu1 %v3844_v9  ;;  %3327 = vmatpush3.bf16.msra.mxu0 %v3844_v9  ;;  %v79_v32 = vld [vmem:[#allocation8 + $0x10] sm:$0xff]  ;;  %v3879_v33 = vpack.c.bf16 %v78_v31, %v77_v30  ;;  %v81_v36 = vld [vmem:[#allocation8 + $0x20] sm:$0xff]  ;;  %v82_v37 = vld [vmem:[#allocation8 + $0x28] sm:$0xff]  ;;  %v98_v43 = vsub.s32 1, %v3838_v4 }
  0x3e   :  { %3310 = vmatprep.subr.bf16.mxu1 %v3736_v2  ;;  %3328 = vmatprep.subr.bf16.mxu0 %v3736_v2  ;;  %v3882_v35 = vpack.c.bf16 %v80_v34, %v79_v32  ;;  %v3886_v38 = vpack.c.bf16 %v82_v37, %v81_v36  ;;  %v83_v39 = vld [vmem:[#allocation8 + $0x30] sm:$0xff]  ;;  %v84_v40 = vld [vmem:[#allocation8 + $0x38] sm:$0xff] }
  0x3f   :  { %v92_v12 = vrot.slane %v3846_v11, %v91_v5  ;;  %v3891_v42 = vpack.c.bf16 %v84_v40, %v83_v39  ;;  %v99_v44 = vrot.slane %v3846_v11, %v98_v43  ;;  %v3923_v52 = vld [vmem:[%s4460_s5] ss:$0 sm:$0xff] }
  0x41   :  { %94 = vbcast.lane.b32.xlu0 %v92_v12, 256  ;;  %3312 = vmatpush3.bf16.msra.mxu1 %v3850_v13 }
  0x42   :  { %3330 = vmatpush3.bf16.msra.mxu0 %v3850_v13  ;;  %3313 = vmatprep.subr.bf16.mxu1 %v3736_v2 }
  0x43   :  { %3331 = vmatprep.subr.bf16.mxu0 %v3736_v2 }
  0x44   :  { %2956 = vmatmul.mubr.f32.vlgmr.msra.gmra.mrb[0].mxu1 %v3738_v3 }
  0x45   :  { %2974 = vmatprep.mubr.msk.f32.mxu1 %vm3737_vm0, %v3738_v3  ;;  %3315 = vmatpush3.bf16.msra.mxu1 %v3879_v33 }
  0x46   :  { %3316 = vmatprep.subr.bf16.mxu1 %v3736_v2 }
  0x49   :  { %3318 = vmatpush3.bf16.msra.mxu1 %v3882_v35 }
  0x4a   :  { %3319 = vmatprep.subr.bf16.mxu1 %v3736_v2 }
  0x4d   :  { %3321 = vmatpush3.bf16.msra.mxu1 %v3886_v38 }
  0x4e   :  { %3322 = vmatprep.subr.bf16.mxu1 %v3736_v2 }
  0x51   :  { %3324 = vmatpush3.bf16.msra.mxu1 %v3891_v42 }
  0x52   :  { %3343 = vmatprep.subr.bf16.mxu1 %v3736_v2 }
  0xb3   :  { %v95_v14 = vpop.permute.xlu0 %94 }
  0xb4   :  { %v151_v16 = vmul.f32 %v3865_v15, %v95_v14 }
  0xb6   :  { %v165_v18 = vadd.f32 %v3871_v17, %v151_v16 }
 0x117   :  { %v245_v19 = vpop.f32.mrb[0].mxu1 }
 0x118   :  { %v249_v20 = vadd.f32 %v245_v19, %v165_v18  ;;  %v2957_v21 = vpop.f32.mrb[1].mxu1 }
 0x11a   :  { %3538 = vtanh.f32 %v249_v20 }
 0x124   :  { %v3539_v22 = vpop.eup %3538 }
 0x125   :  { %255 = vrot.lane.b32.xlu0 %v3539_v22, %s3739_s22  ;;  %v251_v23 = vmul.f32 0.5, %v3539_v22  ;;  %v105_v22 = vsub.s32 2, %v3838_v4 }
 0x127   :  { %v252_v24 = vadd.f32 0.5, %v251_v23 }
 0x129   :  { %v253_v27 = vmul.f32 0.0, %v252_v24 }
 0x197   :  { %v256_v25 = vpop.permute.xlu0 %255 }
 0x198   :  { %v258_v26 = vmul.f32 %v256_v25, %v252_v24 }
 0x19a   :  { %260 = vrot.lane.b32.xlu1 %v258_v26, %s3739_s22 }
 0x20c   :  { %v261_v28 = vpop.permute.xlu1 %260 }
 0x20d   :  { %v3876_v29 = vadd.f32 %v261_v28, %v253_v27  ;;  %v106_v27 = vrot.slane %v3846_v11, %v105_v22 }
 0x20f   :  { %3540 = vtanh.f32 %v3876_v29 }
 0x219   :  { %v3541_v41 = vpop.eup %3540 }
 0x21a   :  { %266 = vrot.lane.b32.xlu1 %v3541_v41, %s3739_s22 }
 0x21e   :  { %101 = vbcast.lane.b32.xlu1 %v99_v44, 256 }
 0x28c   :  { %v267_v45 = vpop.permute.xlu1 %266 }
 0x28d   :  { %v269_v46 = vmul.f32 %v267_v45, %v252_v24 }
 0x28f   :  { %271 = vrot.lane.b32.xlu0 %v269_v46, %s3740_s23 }
 0x290   :  { %v102_v49 = vpop.permute.xlu1 %101 }
 0x291   :  { %v152_v50 = vmul.f32 %v3865_v15, %v102_v49 }
 0x293   :  { %v166_v51 = vadd.f32 %v3871_v17, %v152_v50 }
 0x301   :  { %v272_v47 = vpop.permute.xlu0 %271 }
 0x302   :  { %v274_v48 = vsel %vm175_vm1, %v272_v47, 0.0  ;;  %2986 = vmatmul.mubr.msk.f32.vlgmr.msra.gmra.mrb[0].mxu0 %vm175_vm1, %v272_v47 }
 0x303   :  { %2975 = vmatmul.mubr.msk.f32.vlgmr.msra.gmra.mrb[2].mxu1 %vm281_vm2, %v274_v48  ;;  %3333 = vmatpush3.bf16.msra.mxu0 %v3879_v33 }
 0x304   :  { %3334 = vmatprep.subr.bf16.mxu0 %v3736_v2  ;;  %3345 = vmatpush3.bf16.msra.mxu1 %v3844_v9 }
 0x305   :  { %3346 = vmatprep.subr.bf16.mxu1 %v3736_v2  ;;  %3015 = vmatprep.mubr.msk.f32.mxu1 %vm3737_vm0, %v3738_v3 }
 0x306   :  { %3004 = vmatprep.mubr.msk.f32.mxu0 %vm3737_vm0, %v3738_v3 }
 0x307   :  { %3336 = vmatpush3.bf16.msra.mxu0 %v3882_v35 }
 0x308   :  { %3337 = vmatprep.subr.bf16.mxu0 %v3736_v2  ;;  %3348 = vmatpush3.bf16.msra.mxu1 %v3850_v13 }
 0x309   :  { %3349 = vmatprep.subr.bf16.mxu1 %v3736_v2 }
 0x30b   :  { %3339 = vmatpush3.bf16.msra.mxu0 %v3886_v38 }
 0x30c   :  { %3340 = vmatprep.subr.bf16.mxu0 %v3736_v2 }
 0x30f   :  { %3342 = vmatpush3.bf16.msra.mxu0 %v3891_v42 }
 0x310   :  { %3361 = vmatprep.subr.bf16.mxu0 %v3736_v2 }
 0x3d5   :  { %v473_v53 = vpop.f32.mrb[0].mxu0 }
 0x3d6   :  { %v477_v54 = vadd.f32 %v473_v53, %v166_v51  ;;  %v351_v55 = vpop.f32.mrb[2].mxu1  ;;  %v2987_v56 = vpop.f32.mrb[1].mxu0 }
 0x3d7   :  { %v352_v57 = vadd.f32 %v3923_v52, %v351_v55  ;;  %v2976_v58 = vpop.f32.mrb[3].mxu1 }
 0x3d8   :  { %3542 = vtanh.f32 %v477_v54 }
 0x3d9   :  { %3544 = vtanh.f32 %v352_v57 }
 0x3e2   :  { %v3543_v59 = vpop.eup %3542 }
 0x3e3   :  { %v3545_v60 = vpop.eup %3544  ;;  %483 = vrot.lane.b32.xlu1 %v3543_v59, %s3739_s22  ;;  %v479_v61 = vmul.f32 0.5, %v3543_v59 }
 0x3e4   :  { %360 = vrot.lane.b32.xlu0 %v3545_v60, %s3739_s22  ;;  %v356_v62 = vmul.f32 0.5, %v3545_v60 }
 0x3e5   :  { %v480_v63 = vadd.f32 0.5, %v479_v61 }
 0x3e6   :  { %v357_v5 = vadd.f32 0.5, %v356_v62 }
 0x3e7   :  { %v481_v10 = vmul.f32 %v480_v63, %v3876_v29 }
 0x3e8   :  { %v358_v14 = vmul.f32 0.0, %v357_v5 }
 0x455   :  { %v484_v0 = vpop.permute.xlu1 %483 }
 0x456   :  { %v486_v6 = vmul.f32 %v484_v0, %v480_v63  ;;  %v361_v7 = vpop.permute.xlu0 %360 }
 0x457   :  { %v363_v8 = vmul.f32 %v361_v7, %v357_v5 }
 0x458   :  { %488 = vrot.lane.b32.xlu1 %v486_v6, %s3739_s22 }
 0x459   :  { %365 = vrot.lane.b32.xlu0 %v363_v8, %s3739_s22 }
 0x4ca   :  { %v489_v12 = vpop.permute.xlu1 %488 }
 0x4cb   :  { %v3931_v16 = vadd.f32 %v489_v12, %v481_v10  ;;  %v366_v18 = vpop.permute.xlu0 %365 }
 0x4cc   :  { %v3933_v19 = vadd.f32 %v366_v18, %v358_v14 }
 0x4cd   :  { %3546 = vtanh.f32 %v3931_v16 }
 0x4ce   :  { %3548 = vtanh.f32 %v3933_v19 }
 0x4d7   :  { %v3547_v20 = vpop.eup %3546 }
 0x4d8   :  { %v3549_v21 = vpop.eup %3548  ;;  %494 = vrot.lane.b32.xlu1 %v3547_v20, %s3739_s22 }
 0x4d9   :  { %371 = vrot.lane.b32.xlu0 %v3549_v21, %s3739_s22 }
 0x54a   :  { %v495_v23 = vpop.permute.xlu1 %494 }
 0x54b   :  { %v497_v24 = vmul.f32 %v495_v23, %v480_v63  ;;  %v372_v25 = vpop.permute.xlu0 %371  ;;  %v112_v63 = vsub.s32 3, %v3838_v4 }
 0x54c   :  { %v3940_v26 = vmul.f32 %v372_v25, %v357_v5 }
 0x54d   :  { %499 = vrot.lane.b32.xlu0 %v497_v24, %s3740_s23  ;;  %v113_v8 = vrot.slane %v3846_v11, %v112_v63 }
 0x54e   :  { %503 = vrot.lane.b32.xlu1 %v3940_v26, %s3741_s26 }
 0x551   :  { %108 = vbcast.lane.b32.xlu0 %v106_v27, 256 }
 0x5bf   :  { %v500_v28 = vpop.permute.xlu0 %499 }
 0x5c0   :  { %3016 = vmatmul.mubr.msk.f32.vlgmr.msra.gmra.mrb[4].mxu1 %vm175_vm1, %v500_v28  ;;  %v504_v29 = vpop.permute.xlu1 %503 }
 0x5c1   :  { %v506_v30 = vsel %vm175_vm1, %v500_v28, %v504_v29  ;;  %3351 = vmatpush3.bf16.msra.mxu1 %v3879_v33  ;;  %3034 = vmatprep.mubr.msk.f32.mxu1 %vm3737_vm0, %v3738_v3 }
 0x5c2   :  { %3005 = vmatmul.mubr.msk.f32.vlgmr.msra.gmra.mrb[2].mxu0 %vm281_vm2, %v506_v30  ;;  %3352 = vmatprep.subr.bf16.mxu1 %v3736_v2 }
 0x5c3   :  { %3363 = vmatpush3.bf16.msra.mxu0 %v3844_v9  ;;  %3045 = vmatprep.mubr.msk.f32.mxu0 %vm3737_vm0, %v3738_v3  ;;  %v109_v31 = vpop.permute.xlu0 %108 }
 0x5c4   :  { %3364 = vmatprep.subr.bf16.mxu0 %v3736_v2  ;;  %v153_v32 = vmul.f32 %v3865_v15, %v109_v31 }
 0x5c5   :  { %3354 = vmatpush3.bf16.msra.mxu1 %v3882_v35 }
 0x5c6   :  { %3355 = vmatprep.subr.bf16.mxu1 %v3736_v2  ;;  %v167_v34 = vadd.f32 %v3871_v17, %v153_v32 }
 0x5c7   :  { %3366 = vmatpush3.bf16.msra.mxu0 %v3850_v13 }
 0x5c8   :  { %3367 = vmatprep.subr.bf16.mxu0 %v3736_v2 }
 0x5c9   :  { %3357 = vmatpush3.bf16.msra.mxu1 %v3886_v38 }
 0x5ca   :  { %3358 = vmatprep.subr.bf16.mxu1 %v3736_v2 }
 0x5cd   :  { %3360 = vmatpush3.bf16.msra.mxu1 %v3891_v42 }
 0x5ce   :  { %3379 = vmatprep.subr.bf16.mxu1 %v3736_v2 }
 0x693   :  { %v684_v36 = vpop.f32.mrb[4].mxu1 }
 0x694   :  { %v688_v37 = vadd.f32 %v684_v36, %v167_v34  ;;  %v3017_v39 = vpop.f32.mrb[5].mxu1 }
 0x695   :  { %v576_v40 = vpop.f32.mrb[2].mxu0 }
 0x696   :  { %3550 = vtanh.f32 %v688_v37  ;;  %v577_v41 = vadd.f32 %v3923_v52, %v576_v40  ;;  %v3006_v43 = vpop.f32.mrb[3].mxu0 }
 0x698   :  { %3552 = vtanh.f32 %v577_v41 }
 0x6a0   :  { %v3551_v44 = vpop.eup %3550 }
 0x6a1   :  { %694 = vrot.lane.b32.xlu0 %v3551_v44, %s3739_s22  ;;  %v690_v46 = vmul.f32 0.5, %v3551_v44 }
 0x6a2   :  { %v3553_v45 = vpop.eup %3552 }
 0x6a3   :  { %585 = vrot.lane.b32.xlu1 %v3553_v45, %s3739_s22  ;;  %v581_v47 = vmul.f32 0.5, %v3553_v45  ;;  %v691_v48 = vadd.f32 0.5, %v690_v46 }
 0x6a5   :  { %v582_v51 = vadd.f32 0.5, %v581_v47  ;;  %v692_v55 = vmul.f32 %v691_v48, %v3931_v16 }
 0x6a7   :  { %v583_v58 = vmul.f32 %v582_v51, %v3933_v19 }
 0x713   :  { %v695_v49 = vpop.permute.xlu0 %694 }
 0x714   :  { %v697_v50 = vmul.f32 %v695_v49, %v691_v48  ;;  %v119_v49 = vsub.s32 4, %v3838_v4 }
 0x715   :  { %v586_v53 = vpop.permute.xlu1 %585 }
 0x716   :  { %v588_v54 = vmul.f32 %v586_v53, %v582_v51  ;;  %699 = vrot.lane.b32.xlu0 %v697_v50, %s3739_s22 }
 0x718   :  { %590 = vrot.lane.b32.xlu1 %v588_v54, %s3739_s22  ;;  %v120_v54 = vrot.slane %v3846_v11, %v119_v49 }
 0x788   :  { %v700_v56 = vpop.permute.xlu0 %699 }
 0x789   :  { %v3973_v57 = vadd.f32 %v700_v56, %v692_v55 }
 0x78a   :  { %v591_v59 = vpop.permute.xlu1 %590 }
 0x78b   :  { %3554 = vtanh.f32 %v3973_v57  ;;  %v593_v60 = vadd.f32 %v591_v59, %v583_v58 }
 0x78d   :  { %3556 = vtanh.f32 %v593_v60 }
 0x795   :  { %v3555_v61 = vpop.eup %3554 }
 0x796   :  { %705 = vrot.lane.b32.xlu0 %v3555_v61, %s3739_s22 }
 0x797   :  { %v3557_v62 = vpop.eup %3556 }
 0x798   :  { %596 = vrot.lane.b32.xlu1 %v3557_v62, %s3739_s22 }
 0x808   :  { %v706_v0 = vpop.permute.xlu0 %705 }
 0x809   :  { %v708_v5 = vmul.f32 %v706_v0, %v691_v48 }
 0x80a   :  { %v597_v6 = vpop.permute.xlu1 %596 }
 0x80b   :  { %v3980_v7 = vmul.f32 %v597_v6, %v582_v51  ;;  %710 = vrot.lane.b32.xlu1 %v708_v5, %s3740_s23 }
 0x80d   :  { %714 = vrot.lane.b32.xlu0 %v3980_v7, %s3741_s26 }
 0x80f   :  { %115 = vbcast.lane.b32.xlu1 %v113_v8, 256 }
 0x87d   :  { %v711_v10 = vpop.permute.xlu1 %710 }
 0x87e   :  { %3046 = vmatmul.mubr.msk.f32.vlgmr.msra.gmra.mrb[4].mxu0 %vm175_vm1, %v711_v10 }
 0x87f   :  { %v715_v12 = vpop.permute.xlu0 %714  ;;  %3369 = vmatpush3.bf16.msra.mxu0 %v3879_v33  ;;  %3064 = vmatprep.mubr.msk.f32.mxu0 %vm3737_vm0, %v3738_v3 }
 0x880   :  { %v717_v14 = vsel %vm175_vm1, %v711_v10, %v715_v12  ;;  %3370 = vmatprep.subr.bf16.mxu0 %v3736_v2 }
 0x881   :  { %3035 = vmatmul.mubr.msk.f32.vlgmr.msra.gmra.mrb[6].mxu1 %vm281_vm2, %v717_v14  ;;  %v116_v16 = vpop.permute.xlu1 %115 }
 0x882   :  { %3381 = vmatpush3.bf16.msra.mxu1 %v3844_v9  ;;  %3075 = vmatprep.mubr.msk.f32.mxu1 %vm3737_vm0, %v3738_v3  ;;  %v154_v18 = vmul.f32 %v3865_v15, %v116_v16 }
 0x883   :  { %3372 = vmatpush3.bf16.msra.mxu0 %v3882_v35  ;;  %3382 = vmatprep.subr.bf16.mxu1 %v3736_v2 }
 0x884   :  { %3373 = vmatprep.subr.bf16.mxu0 %v3736_v2  ;;  %v168_v19 = vadd.f32 %v3871_v17, %v154_v18 }
 0x886   :  { %3384 = vmatpush3.bf16.msra.mxu1 %v3850_v13 }
 0x887   :  { %3375 = vmatpush3.bf16.msra.mxu0 %v3886_v38  ;;  %3385 = vmatprep.subr.bf16.mxu1 %v3736_v2 }
 0x888   :  { %3376 = vmatprep.subr.bf16.mxu0 %v3736_v2 }
 0x88b   :  { %3378 = vmatpush3.bf16.msra.mxu0 %v3891_v42 }
 0x88c   :  { %3397 = vmatprep.subr.bf16.mxu0 %v3736_v2 }
 0x951   :  { %v895_v20 = vpop.f32.mrb[4].mxu0 }
 0x952   :  { %v899_v21 = vadd.f32 %v895_v20, %v168_v19  ;;  %v3047_v22 = vpop.f32.mrb[5].mxu0 }
 0x954   :  { %3558 = vtanh.f32 %v899_v21  ;;  %v787_v23 = vpop.f32.mrb[6].mxu1 }
 0x955   :  { %v788_v24 = vadd.f32 %v3923_v52, %v787_v23  ;;  %v3036_v25 = vpop.f32.mrb[7].mxu1 }
 0x957   :  { %3560 = vtanh.f32 %v788_v24 }
 0x95e   :  { %v3559_v27 = vpop.eup %3558 }
 0x95f   :  { %905 = vrot.lane.b32.xlu1 %v3559_v27, %s3739_s22  ;;  %v901_v29 = vmul.f32 0.5, %v3559_v27 }
 0x961   :  { %v3561_v28 = vpop.eup %3560  ;;  %v902_v31 = vadd.f32 0.5, %v901_v29 }
 0x962   :  { %796 = vrot.lane.b32.xlu0 %v3561_v28, %s3739_s22  ;;  %v792_v30 = vmul.f32 0.5, %v3561_v28 }
 0x963   :  { %v903_v40 = vmul.f32 %v902_v31, %v3973_v57 }
 0x964   :  { %v793_v36 = vadd.f32 0.5, %v792_v30 }
 0x966   :  { %v794_v44 = vmul.f32 %v793_v36, %v593_v60 }
 0x9d1   :  { %v906_v32 = vpop.permute.xlu1 %905 }
 0x9d2   :  { %v908_v34 = vmul.f32 %v906_v32, %v902_v31 }
 0x9d4   :  { %v797_v37 = vpop.permute.xlu0 %796  ;;  %910 = vrot.lane.b32.xlu1 %v908_v34, %s3739_s22  ;;  %v126_v34 = vsub.s32 5, %v3838_v4 }
 0x9d5   :  { %v799_v39 = vmul.f32 %v797_v37, %v793_v36 }
 0x9d7   :  { %801 = vrot.lane.b32.xlu0 %v799_v39, %s3739_s22  ;;  %v127_v39 = vrot.slane %v3846_v11, %v126_v34 }
 0xa46   :  { %v911_v41 = vpop.permute.xlu1 %910 }
 0xa47   :  { %v4013_v43 = vadd.f32 %v911_v41, %v903_v40 }
 0xa49   :  { %3562 = vtanh.f32 %v4013_v43  ;;  %v802_v45 = vpop.permute.xlu0 %801 }
 0xa4a   :  { %v4016_v46 = vadd.f32 %v802_v45, %v794_v44 }
 0xa4c   :  { %3564 = vtanh.f32 %v4016_v46 }
 0xa53   :  { %v3563_v47 = vpop.eup %3562 }
 0xa54   :  { %916 = vrot.lane.b32.xlu1 %v3563_v47, %s3739_s22 }
 0xa56   :  { %v3565_v48 = vpop.eup %3564 }
 0xa57   :  { %807 = vrot.lane.b32.xlu0 %v3565_v48, %s3739_s22 }
 0xac6   :  { %v917_v50 = vpop.permute.xlu1 %916 }
 0xac7   :  { %v919_v51 = vmul.f32 %v917_v50, %v902_v31 }
 0xac9   :  { %v808_v53 = vpop.permute.xlu0 %807  ;;  %921 = vrot.lane.b32.xlu0 %v919_v51, %s3740_s23 }
 0xaca   :  { %v4024_v55 = vmul.f32 %v808_v53, %v793_v36 }
 0xacc   :  { %925 = vrot.lane.b32.xlu1 %v4024_v55, %s3741_s26 }
 0xacd   :  { %122 = vbcast.lane.b32.xlu0 %v120_v54, 256 }
 0xb3b   :  { %v922_v56 = vpop.permute.xlu0 %921 }
 0xb3c   :  { %3076 = vmatmul.mubr.msk.f32.vlgmr.msra.gmra.mrb[8].mxu1 %vm175_vm1, %v922_v56 }
 0xb3d   :  { %3387 = vmatpush3.bf16.msra.mxu1 %v3879_v33  ;;  %3094 = vmatprep.mubr.msk.f32.mxu1 %vm3737_vm0, %v3738_v3 }
 0xb3e   :  { %v926_v57 = vpop.permute.xlu1 %925  ;;  %3388 = vmatprep.subr.bf16.mxu1 %v3736_v2 }
 0xb3f   :  { %v928_v58 = vsel %vm175_vm1, %v922_v56, %v926_v57  ;;  %v123_v59 = vpop.permute.xlu0 %122 }
 0xb40   :  { %3065 = vmatmul.mubr.msk.f32.vlgmr.msra.gmra.mrb[6].mxu0 %vm281_vm2, %v928_v58  ;;  %v155_v60 = vmul.f32 %v3865_v15, %v123_v59 }
 0xb41   :  { %3399 = vmatpush3.bf16.msra.mxu0 %v3844_v9  ;;  %3390 = vmatpush3.bf16.msra.mxu1 %v3882_v35 }
 0xb42   :  { %3400 = vmatprep.subr.bf16.mxu0 %v3736_v2  ;;  %3391 = vmatprep.subr.bf16.mxu1 %v3736_v2  ;;  %v169_v61 = vadd.f32 %v3871_v17, %v155_v60 }
 0xb43   :  { %3105 = vmatprep.mubr.msk.f32.mxu0 %vm3737_vm0, %v3738_v3 }
 0xb45   :  { %3402 = vmatpush3.bf16.msra.mxu0 %v3850_v13  ;;  %3393 = vmatpush3.bf16.msra.mxu1 %v3886_v38 }
 0xb46   :  { %3394 = vmatprep.subr.bf16.mxu1 %v3736_v2  ;;  %3403 = vmatprep.subr.bf16.mxu0 %v3736_v2 }
 0xb49   :  { %3396 = vmatpush3.bf16.msra.mxu1 %v3891_v42 }
 0xb4a   :  { %3415 = vmatprep.subr.bf16.mxu1 %v3736_v2 }
 0xc0f   :  { %v1106_v62 = vpop.f32.mrb[8].mxu1 }
 0xc10   :  { %v1110_v63 = vadd.f32 %v1106_v62, %v169_v61  ;;  %v3077_v0 = vpop.f32.mrb[9].mxu1 }
 0xc12   :  { %3566 = vtanh.f32 %v1110_v63 }
 0xc13   :  { %v998_v5 = vpop.f32.mrb[6].mxu0 }
 0xc14   :  { %v999_v6 = vadd.f32 %v3923_v52, %v998_v5  ;;  %v3066_v8 = vpop.f32.mrb[7].mxu0 }
 0xc16   :  { %3568 = vtanh.f32 %v999_v6 }
 0xc1c   :  { %v3567_v10 = vpop.eup %3566 }
 0xc1d   :  { %1116 = vrot.lane.b32.xlu0 %v3567_v10, %s3739_s22  ;;  %v1112_v14 = vmul.f32 0.5, %v3567_v10 }
 0xc1f   :  { %v1113_v16 = vadd.f32 0.5, %v1112_v14 }
 0xc20   :  { %v3569_v12 = vpop.eup %3568 }
 0xc21   :  { %1007 = vrot.lane.b32.xlu1 %v3569_v12, %s3739_s22  ;;  %v1003_v18 = vmul.f32 0.5, %v3569_v12  ;;  %v1114_v24 = vmul.f32 %v1113_v16, %v4013_v43 }
 0xc23   :  { %v1004_v21 = vadd.f32 0.5, %v1003_v18 }
 0xc25   :  { %v1005_v28 = vmul.f32 %v1004_v21, %v4016_v46 }
 0xc8f   :  { %v1117_v19 = vpop.permute.xlu0 %1116 }
 0xc90   :  { %v1119_v20 = vmul.f32 %v1117_v19, %v1113_v16 }
 0xc92   :  { %1121 = vrot.lane.b32.xlu0 %v1119_v20, %s3739_s22 }
 0xc93   :  { %v1008_v22 = vpop.permute.xlu1 %1007 }
 0xc94   :  { %v1010_v23 = vmul.f32 %v1008_v22, %v1004_v21 }
 0xc96   :  { %1012 = vrot.lane.b32.xlu1 %v1010_v23, %s3739_s22 }
 0xd04   :  { %v1122_v25 = vpop.permute.xlu0 %1121 }
 0xd05   :  { %v4055_v27 = vadd.f32 %v1122_v25, %v1114_v24 }
 0xd07   :  { %3570 = vtanh.f32 %v4055_v27 }
 0xd08   :  { %v1013_v29 = vpop.permute.xlu1 %1012 }
 0xd09   :  { %v4059_v30 = vadd.f32 %v1013_v29, %v1005_v28 }
 0xd0b   :  { %3572 = vtanh.f32 %v4059_v30 }
 0xd11   :  { %v3571_v31 = vpop.eup %3570 }
 0xd12   :  { %1127 = vrot.lane.b32.xlu0 %v3571_v31, %s3739_s22 }
 0xd15   :  { %v3573_v32 = vpop.eup %3572 }
 0xd16   :  { %1018 = vrot.lane.b32.xlu1 %v3573_v32, %s3739_s22 }
 0xd84   :  { %v1128_v36 = vpop.permute.xlu0 %1127 }
 0xd85   :  { %v1130_v37 = vmul.f32 %v1128_v36, %v1113_v16 }
 0xd87   :  { %1132 = vrot.lane.b32.xlu1 %v1130_v37, %s3740_s23 }
 0xd88   :  { %v1019_v40 = vpop.permute.xlu1 %1018 }
 0xd89   :  { %v4067_v41 = vmul.f32 %v1019_v40, %v1004_v21  ;;  %v133_v21 = vsub.s32 6, %v3838_v4 }
 0xd8b   :  { %1136 = vrot.lane.b32.xlu0 %v4067_v41, %s3741_s26  ;;  %129 = vbcast.lane.b32.xlu1 %v127_v39, 256  ;;  %v134_v24 = vrot.slane %v3846_v11, %v133_v21 }
 0xdf9   :  { %v1133_v43 = vpop.permute.xlu1 %1132 }
 0xdfa   :  { %3106 = vmatmul.mubr.msk.f32.vlgmr.msra.gmra.mrb[8].mxu0 %vm175_vm1, %v1133_v43 }
 0xdfb   :  { %3405 = vmatpush3.bf16.msra.mxu0 %v3879_v33  ;;  %3124 = vmatprep.mubr.msk.f32.mxu0 %vm3737_vm0, %v3738_v3 }
 0xdfc   :  { %3406 = vmatprep.subr.bf16.mxu0 %v3736_v2 }
 0xdfd   :  { %v1137_v44 = vpop.permute.xlu0 %1136  ;;  %v130_v46 = vpop.permute.xlu1 %129 }
 0xdfe   :  { %v1139_v45 = vsel %vm175_vm1, %v1133_v43, %v1137_v44  ;;  %v156_v47 = vmul.f32 %v3865_v15, %v130_v46 }
 0xdff   :  { %3095 = vmatmul.mubr.msk.f32.vlgmr.msra.gmra.mrb[10].mxu1 %vm281_vm2, %v1139_v45  ;;  %3408 = vmatpush3.bf16.msra.mxu0 %v3882_v35 }
 0xe00   :  { %3417 = vmatpush3.bf16.msra.mxu1 %v3844_v9  ;;  %3409 = vmatprep.subr.bf16.mxu0 %v3736_v2  ;;  %v170_v48 = vadd.f32 %v3871_v17, %v156_v47 }
 0xe01   :  { %3418 = vmatprep.subr.bf16.mxu1 %v3736_v2  ;;  %3135 = vmatprep.mubr.msk.f32.mxu1 %vm3737_vm0, %v3738_v3 }
 0xe03   :  { %3411 = vmatpush3.bf16.msra.mxu0 %v3886_v38 }
 0xe04   :  { %3420 = vmatpush3.bf16.msra.mxu1 %v3850_v13  ;;  %3412 = vmatprep.subr.bf16.mxu0 %v3736_v2 }
 0xe05   :  { %3421 = vmatprep.subr.bf16.mxu1 %v3736_v2 }
 0xe07   :  { %3414 = vmatpush3.bf16.msra.mxu0 %v3891_v42 }
 0xe08   :  { %3433 = vmatprep.subr.bf16.mxu0 %v3736_v2 }
 0xecd   :  { %v1317_v49 = vpop.f32.mrb[8].mxu0 }
 0xece   :  { %v1321_v50 = vadd.f32 %v1317_v49, %v170_v48  ;;  %v3107_v51 = vpop.f32.mrb[9].mxu0 }
 0xed0   :  { %3574 = vtanh.f32 %v1321_v50 }
 0xed2   :  { %v1209_v53 = vpop.f32.mrb[10].mxu1 }
 0xed3   :  { %v1210_v54 = vadd.f32 %v3923_v52, %v1209_v53  ;;  %v3096_v56 = vpop.f32.mrb[11].mxu1 }
 0xed5   :  { %3576 = vtanh.f32 %v1210_v54 }
 0xeda   :  { %v3575_v57 = vpop.eup %3574 }
 0xedb   :  { %1327 = vrot.lane.b32.xlu1 %v3575_v57, %s3739_s22  ;;  %v1323_v59 = vmul.f32 0.5, %v3575_v57 }
 0xedd   :  { %v1324_v60 = vadd.f32 0.5, %v1323_v59 }
 0xedf   :  { %v3577_v58 = vpop.eup %3576  ;;  %v1325_v8 = vmul.f32 %v1324_v60, %v4055_v27 }
 0xee0   :  { %1218 = vrot.lane.b32.xlu0 %v3577_v58, %s3739_s22  ;;  %v1214_v62 = vmul.f32 0.5, %v3577_v58 }
 0xee2   :  { %v1215_v0 = vadd.f32 0.5, %v1214_v62 }
 0xee4   :  { %v1216_v14 = vmul.f32 %v1215_v0, %v4059_v30 }
 0xf4d   :  { %v1328_v61 = vpop.permute.xlu1 %1327 }
 0xf4e   :  { %v1330_v63 = vmul.f32 %v1328_v61, %v1324_v60 }
 0xf50   :  { %1332 = vrot.lane.b32.xlu1 %v1330_v63, %s3739_s22 }
 0xf52   :  { %v1219_v5 = vpop.permute.xlu0 %1218 }
 0xf53   :  { %v1221_v6 = vmul.f32 %v1219_v5, %v1215_v0  ;;  %v140_v5 = vsub.s32 7, %v3838_v4 }
 0xf55   :  { %1223 = vrot.lane.b32.xlu0 %v1221_v6, %s3739_s22 }
 0xfc2   :  { %v1333_v10 = vpop.permute.xlu1 %1332 }
 0xfc3   :  { %v4098_v12 = vadd.f32 %v1333_v10, %v1325_v8  ;;  %v141_v10 = vrot.slane %v3846_v11, %v140_v5 }
 0xfc5   :  { %3578 = vtanh.f32 %v4098_v12 }
 0xfc7   :  { %v1224_v16 = vpop.permute.xlu0 %1223 }
 0xfc8   :  { %v4102_v18 = vadd.f32 %v1224_v16, %v1216_v14 }
 0xfca   :  { %3580 = vtanh.f32 %v4102_v18 }
 0xfcf   :  { %v3579_v19 = vpop.eup %3578 }
 0xfd0   :  { %1338 = vrot.lane.b32.xlu1 %v3579_v19, %s3739_s22 }
 0xfd4   :  { %v3581_v20 = vpop.eup %3580 }
 0xfd5   :  { %1229 = vrot.lane.b32.xlu0 %v3581_v20, %s3739_s22 }
0x1042   :  { %v1339_v22 = vpop.permute.xlu1 %1338 }
0x1043   :  { %v1341_v23 = vmul.f32 %v1339_v22, %v1324_v60 }
0x1045   :  { %1343 = vrot.lane.b32.xlu0 %v1341_v23, %s3740_s23 }
0x1047   :  { %v1230_v25 = vpop.permute.xlu0 %1229 }
0x1048   :  { %v4110_v27 = vmul.f32 %v1230_v25, %v1215_v0 }
0x1049   :  { %136 = vbcast.lane.b32.xlu0 %v134_v24, 256 }
0x104a   :  { %1347 = vrot.lane.b32.xlu1 %v4110_v27, %s3741_s26 }
0x10b7   :  { %v1344_v28 = vpop.permute.xlu0 %1343 }
0x10b8   :  { %3136 = vmatmul.mubr.msk.f32.vlgmr.msra.gmra.mrb[12].mxu1 %vm175_vm1, %v1344_v28 }
0x10b9   :  { %3423 = vmatpush3.bf16.msra.mxu1 %v3879_v33  ;;  %3154 = vmatprep.mubr.msk.f32.mxu1 %vm3737_vm0, %v3738_v3 }
0x10ba   :  { %3424 = vmatprep.subr.bf16.mxu1 %v3736_v2 }
0x10bb   :  { %v137_v31 = vpop.permute.xlu0 %136 }
0x10bc   :  { %v1348_v29 = vpop.permute.xlu1 %1347  ;;  %v157_v32 = vmul.f32 %v3865_v15, %v137_v31 }
0x10bd   :  { %v1350_v30 = vsel %vm175_vm1, %v1344_v28, %v1348_v29  ;;  %3426 = vmatpush3.bf16.msra.mxu1 %v3882_v35 }
0x10be   :  { %3125 = vmatmul.mubr.msk.f32.vlgmr.msra.gmra.mrb[10].mxu0 %vm281_vm2, %v1350_v30  ;;  %3427 = vmatprep.subr.bf16.mxu1 %v3736_v2  ;;  %v171_v34 = vadd.f32 %v3871_v17, %v157_v32 }
0x10bf   :  { %3435 = vmatpush3.bf16.msra.mxu0 %v3844_v9  ;;  %3165 = vmatprep.mubr.msk.f32.mxu0 %vm3737_vm0, %v3738_v3 }
0x10c0   :  { %3436 = vmatprep.subr.bf16.mxu0 %v3736_v2 }
0x10c1   :  { %3429 = vmatpush3.bf16.msra.mxu1 %v3886_v38 }
0x10c2   :  { %3430 = vmatprep.subr.bf16.mxu1 %v3736_v2 }
0x10c3   :  { %3438 = vmatpush3.bf16.msra.mxu0 %v3850_v13 }
0x10c4   :  { %3439 = vmatprep.subr.bf16.mxu0 %v3736_v2 }
0x10c5   :  { %3432 = vmatpush3.bf16.msra.mxu1 %v3891_v42 }
0x10c6   :  { %3451 = vmatprep.subr.bf16.mxu1 %v3736_v2 }
0x118b   :  { %v1528_v36 = vpop.f32.mrb[12].mxu1 }
0x118c   :  { %v1532_v37 = vadd.f32 %v1528_v36, %v171_v34  ;;  %v3137_v39 = vpop.f32.mrb[13].mxu1 }
0x118e   :  { %3582 = vtanh.f32 %v1532_v37 }
0x1191   :  { %v1420_v40 = vpop.f32.mrb[10].mxu0 }
0x1192   :  { %v1421_v43 = vadd.f32 %v3923_v52, %v1420_v40  ;;  %v3126_v44 = vpop.f32.mrb[11].mxu0 }
0x1194   :  { %3584 = vtanh.f32 %v1421_v43 }
0x1198   :  { %v3583_v45 = vpop.eup %3582 }
0x1199   :  { %1538 = vrot.lane.b32.xlu0 %v3583_v45, %s3739_s22  ;;  %v1534_v47 = vmul.f32 0.5, %v3583_v45 }
0x119b   :  { %v1535_v48 = vadd.f32 0.5, %v1534_v47 }
0x119d   :  { %v1536_v57 = vmul.f32 %v1535_v48, %v4098_v12 }
0x119e   :  { %v3585_v46 = vpop.eup %3584 }
0x119f   :  { %1429 = vrot.lane.b32.xlu1 %v3585_v46, %s3739_s22  ;;  %v1425_v51 = vmul.f32 0.5, %v3585_v46 }
0x11a1   :  { %v1426_v53 = vadd.f32 0.5, %v1425_v51 }
0x11a3   :  { %v1427_v60 = vmul.f32 %v1426_v53, %v4102_v18 }
0x120b   :  { %v1539_v49 = vpop.permute.xlu0 %1538 }
0x120c   :  { %v1541_v50 = vmul.f32 %v1539_v49, %v1535_v48 }
0x120e   :  { %1543 = vrot.lane.b32.xlu0 %v1541_v50, %s3739_s22 }
0x1211   :  { %v1430_v54 = vpop.permute.xlu1 %1429 }
0x1212   :  { %v1432_v56 = vmul.f32 %v1430_v54, %v1426_v53 }
0x1214   :  { %1434 = vrot.lane.b32.xlu1 %v1432_v56, %s3739_s22 }
0x1280   :  { %v1544_v58 = vpop.permute.xlu0 %1543 }
0x1281   :  { %v4141_v59 = vadd.f32 %v1544_v58, %v1536_v57 }
0x1283   :  { %3586 = vtanh.f32 %v4141_v59 }
0x1286   :  { %v1435_v61 = vpop.permute.xlu1 %1434 }
0x1287   :  { %v4145_v62 = vadd.f32 %v1435_v61, %v1427_v60 }
0x1289   :  { %3588 = vtanh.f32 %v4145_v62 }
0x128d   :  { %v3587_v63 = vpop.eup %3586 }
0x128e   :  { %1549 = vrot.lane.b32.xlu0 %v3587_v63, %s3739_s22 }
0x1293   :  { %v3589_v0 = vpop.eup %3588 }
0x1294   :  { %1440 = vrot.lane.b32.xlu1 %v3589_v0, %s3739_s22 }
0x1300   :  { %v1550_v6 = vpop.permute.xlu0 %1549 }
0x1301   :  { %v1552_v8 = vmul.f32 %v1550_v6, %v1535_v48 }
0x1303   :  { %1554 = vrot.lane.b32.xlu1 %v1552_v8, %s3740_s23 }
0x1306   :  { %v1441_v12 = vpop.permute.xlu1 %1440 }
0x1307   :  { %v4153_v14 = vmul.f32 %v1441_v12, %v1426_v53  ;;  %143 = vbcast.lane.b32.xlu1 %v141_v10, 256  ;;  %v2755_v12 = vld [vmem:[%s4461_s6] ss:$0 sm:$0xff] }
0x1309   :  { %1558 = vrot.lane.b32.xlu0 %v4153_v14, %s3741_s26 }
0x1375   :  { %v1555_v16 = vpop.permute.xlu1 %1554 }
0x1376   :  { %3166 = vmatmul.mubr.msk.f32.vlgmr.msra.gmra.mrb[12].mxu0 %vm175_vm1, %v1555_v16 }
0x1377   :  { %3441 = vmatpush3.bf16.msra.mxu0 %v3879_v33  ;;  %3184 = vmatprep.mubr.msk.f32.mxu0 %vm3737_vm0, %v3738_v3 }
0x1378   :  { %3442 = vmatprep.subr.bf16.mxu0 %v3736_v2 }
0x1379   :  { %v144_v18 = vpop.permute.xlu1 %143 }
0x137a   :  { %v158_v19 = vmul.f32 %v3865_v15, %v144_v18 }
0x137b   :  { %v1559_v4 = vpop.permute.xlu0 %1558  ;;  %3444 = vmatpush3.bf16.msra.mxu0 %v3882_v35 }
0x137c   :  { %v1561_v11 = vsel %vm175_vm1, %v1555_v16, %v1559_v4  ;;  %3445 = vmatprep.subr.bf16.mxu0 %v3736_v2  ;;  %v172_v20 = vadd.f32 %v3871_v17, %v158_v19 }
0x137d   :  { %3155 = vmatmul.mubr.msk.f32.vlgmr.msra.gmra.mrb[14].mxu1 %vm281_vm2, %v1561_v11 }
0x137e   :  { %3453 = vmatpush3.bf16.msra.mxu1 %v3844_v9  ;;  %3195 = vmatprep.mubr.msk.f32.mxu1 %vm3737_vm0, %v3738_v3 }
0x137f   :  { %3454 = vmatprep.subr.bf16.mxu1 %v3736_v2  ;;  %3447 = vmatpush3.bf16.msra.mxu0 %v3886_v38 }
0x1380   :  { %3448 = vmatprep.subr.bf16.mxu0 %v3736_v2 }
0x1382   :  { %3456 = vmatpush3.bf16.msra.mxu1 %v3850_v13 }
0x1383   :  { %3450 = vmatpush3.bf16.msra.mxu0 %v3891_v42  ;;  %3457 = vmatprep.subr.bf16.mxu1 %v3736_v2 }
0x1384   :  { %3469 = vmatprep.subr.bf16.mxu0 %v3736_v2 }
0x1449   :  { %v1739_v21 = vpop.f32.mrb[12].mxu0 }
0x144a   :  { %v1743_v22 = vadd.f32 %v1739_v21, %v172_v20  ;;  %v3167_v23 = vpop.f32.mrb[13].mxu0 }
0x144c   :  { %3590 = vtanh.f32 %v1743_v22 }
0x1450   :  { %v1631_v24 = vpop.f32.mrb[14].mxu1 }
0x1451   :  { %v1632_v25 = vadd.f32 %v3923_v52, %v1631_v24  ;;  %v3156_v28 = vpop.f32.mrb[15].mxu1  ;;  %v3742_v24 = vmov 0  }
0x1452   :  { %3536 = vset.pattern.permute.xlu0 %v3742_v24  ;;  %3537 = vset.pattern.permute.xlu1 %v3742_v24 }
0x1453   :  { %3592 = vtanh.f32 %v1632_v25  ;;  %v4230_v25 = vld [vmem:[#allocation2] ss:$0 sm:$0xff] }
0x1456   :  { %v3591_v29 = vpop.eup %3590 }
0x1457   :  { %1749 = vrot.lane.b32.xlu1 %v3591_v29, %s3739_s22  ;;  %v1745_v31 = vmul.f32 0.5, %v3591_v29 }
0x1459   :  { %v1746_v32 = vadd.f32 0.5, %v1745_v31  ;;  %v4238_v31 = vld [vmem:[%s4456_s1] ss:$0 sm:$0xff] }
0x145b   :  { %v1747_v40 = vmul.f32 %v1746_v32, %v4141_v59 }
0x145d   :  { %v3593_v30 = vpop.eup %3592 }
0x145e   :  { %1640 = vrot.lane.b32.xlu0 %v3593_v30, %s3739_s22  ;;  %v1636_v17 = vmul.f32 0.5, %v3593_v30 }
0x1460   :  { %v1637_v36 = vadd.f32 0.5, %v1636_v17 }
0x1462   :  { %v1638_v45 = vmul.f32 %v1637_v36, %v4145_v62 }
0x14c9   :  { %v1750_v15 = vpop.permute.xlu1 %1749 }
0x14ca   :  { %v1752_v34 = vmul.f32 %v1750_v15, %v1746_v32  ;;  %v4245_v15 = vld [vmem:[%s4458_s3] ss:$0 sm:$0xff] }
0x14cc   :  { %1754 = vrot.lane.b32.xlu1 %v1752_v34, %s3739_s22 }
0x14d0   :  { %v1641_v37 = vpop.permute.xlu0 %1640 }
0x14d1   :  { %v1643_v39 = vmul.f32 %v1641_v37, %v1637_v36 }
0x14d3   :  { %1645 = vrot.lane.b32.xlu0 %v1643_v39, %s3739_s22 }
0x153e   :  { %v1755_v43 = vpop.permute.xlu1 %1754 }
0x153f   :  { %v4184_v44 = vadd.f32 %v1755_v43, %v1747_v40 }
0x1541   :  { %3594 = vtanh.f32 %v4184_v44 }
0x1545   :  { %v1646_v46 = vpop.permute.xlu0 %1645 }
0x1546   :  { %v1648_v47 = vadd.f32 %v1646_v46, %v1638_v45 }
0x1548   :  { %3596 = vtanh.f32 %v1648_v47 }
0x154b   :  { %v3595_v48 = vpop.eup %3594 }
0x154c   :  { %1760 = vrot.lane.b32.xlu1 %v3595_v48, %s3739_s22 }
0x1552   :  { %v3597_v49 = vpop.eup %3596 }
0x1553   :  { %1651 = vrot.lane.b32.xlu0 %v3597_v49, %s3739_s22 }
0x15be   :  { %v1761_v50 = vpop.permute.xlu1 %1760 }
0x15bf   :  { %v1763_v51 = vmul.f32 %v1761_v50, %v1746_v32 }
0x15c1   :  { %1765 = vrot.lane.b32.xlu0 %v1763_v51, %s3740_s23 }
0x15c5   :  { %v1652_v53 = vpop.permute.xlu0 %1651 }
0x15c6   :  { %v4191_v54 = vmul.f32 %v1652_v53, %v1637_v36 }
0x15c8   :  { %1769 = vrot.lane.b32.xlu1 %v4191_v54, %s3741_s26 }
0x1633   :  { %v1766_v56 = vpop.permute.xlu0 %1765 }
0x1634   :  { %3196 = vmatmul.mubr.msk.f32.vlgmr.msra.gmra.mrb[16].mxu1 %vm175_vm1, %v1766_v56 }
0x1635   :  { %3459 = vmatpush3.bf16.msra.mxu1 %v3879_v33  ;;  %3214 = vmatprep.mubr.msk.f32.mxu1 %vm3737_vm0, %v3738_v3 }
0x1636   :  { %3460 = vmatprep.subr.bf16.mxu1 %v3736_v2 }
0x1639   :  { %3462 = vmatpush3.bf16.msra.mxu1 %v3882_v35 }
0x163a   :  { %v1770_v57 = vpop.permute.xlu1 %1769  ;;  %3463 = vmatprep.subr.bf16.mxu1 %v3736_v2 }
0x163b   :  { %v1772_v58 = vsel %vm175_vm1, %v1766_v56, %v1770_v57 }
0x163c   :  { %3185 = vmatmul.mubr.msk.f32.vlgmr.msra.gmra.mrb[14].mxu0 %vm281_vm2, %v1772_v58 }
0x163d   :  { %3471 = vmatpush3.bf16.msra.mxu0 %v3844_v9  ;;  %3465 = vmatpush3.bf16.msra.mxu1 %v3886_v38 }
0x163e   :  { %3472 = vmatprep.subr.bf16.mxu0 %v3736_v2  ;;  %3225 = vmatprep.mubr.msk.f32.mxu0 %vm3737_vm0, %v3738_v3 }
0x163f   :  { %3466 = vmatprep.subr.bf16.mxu1 %v3736_v2 }
0x1641   :  { %3474 = vmatpush3.bf16.msra.mxu0 %v3850_v13  ;;  %3468 = vmatpush3.bf16.msra.mxu1 %v3891_v42 }
0x1642   :  { %3475 = vmatprep.subr.bf16.mxu0 %v3736_v2  ;;  %3487 = vmatprep.subr.bf16.mxu1 %v3736_v2 }
0x1707   :  { %v1952_v59 = vpop.f32.mrb[16].mxu1 }
0x1708   :  { %v3197_v60 = vpop.f32.mrb[17].mxu1 }
0x170f   :  { %v1842_v61 = vpop.f32.mrb[14].mxu0 }
0x1710   :  { %v1843_v62 = vadd.f32 %v3923_v52, %v1842_v61  ;;  %v3186_v63 = vpop.f32.mrb[15].mxu0 }
0x1712   :  { %3598 = vtanh.f32 %v1843_v62 }
0x171c   :  { %v3599_v0 = vpop.eup %3598 }
0x171d   :  { %1851 = vrot.lane.b32.xlu0 %v3599_v0, %s3739_s22  ;;  %v1847_v5 = vmul.f32 0.5, %v3599_v0 }
0x171f   :  { %v1848_v6 = vadd.f32 0.5, %v1847_v5 }
0x1721   :  { %v1849_v16 = vmul.f32 %v1848_v6, %v1648_v47 }
0x178f   :  { %v1852_v8 = vpop.permute.xlu0 %1851 }
0x1790   :  { %v1854_v10 = vmul.f32 %v1852_v8, %v1848_v6 }
0x1792   :  { %1856 = vrot.lane.b32.xlu1 %v1854_v10, %s3739_s22 }
0x1796   :  { %380 = vrot.lane.b32.xlu1 %v2755_v12, %s3740_s23 }
0x1804   :  { %v1857_v4 = vpop.permute.xlu1 %1856 }
0x1805   :  { %v4221_v52 = vadd.f32 %v1857_v4, %v1849_v16 }
0x1807   :  { %3600 = vtanh.f32 %v4221_v52 }
0x1808   :  { %v4225_v20 = vpop.permute.xlu1 %380 }
0x1811   :  { %v3601_v11 = vpop.eup %3600 }
0x1812   :  { %1862 = vrot.lane.b32.xlu0 %v3601_v11, %s3739_s22 }
0x1884   :  { %v1863_v18 = vpop.permute.xlu0 %1862 }
0x1885   :  { %v1865_v19 = vmul.f32 %v1863_v18, %v1848_v6 }
0x1887   :  { %v1866_v21 = vmul.f32 %v1865_v19, %v4225_v20 }
0x1889   :  { %1868 = vrot.lane.b32.xlu0 %v1866_v21, %s3740_s23 }
0x18fb   :  { %v1869_v22 = vpop.permute.xlu0 %1868 }
0x18fc   :  { %v1871_v23 = vsel %vm175_vm1, %v1869_v22, 0.0 }
0x18fd   :  { %1872 = vadd.xlane.f32.xlu1 %v1871_v23 }
0x198a   :  { %v1873_v28 = vpop.xlane.xlu1 %1872 }
0x198b   :  { %v1874_v29 = vadd.f32 %v4230_v25, %v1873_v28 }
0x198d   :  { %1878 = vperm.xlu0 %3536, %v1874_v29  }
0x1a0c   :  { %v4233_v30 = vpop.permute.xlu0 %1878 }
0x1a0d   :  { %v1882_v32 = vmul.f32 %v4238_v31, %v4233_v30 }
0x1a0f   :  { %v1883_v34 = vadd.f32 %v4245_v15, %v1882_v32 }
0x1a11   :  { %v1956_v17 = vadd.f32 %v1952_v59, %v1883_v34  ;;  %v4279_v59 = vld [vmem:[%s4460_s5] ss:$0 sm:$0xff]  ;;  %s3743_s5 = smov [#allocation9]  }
0x1a12   :  { %s2741_s30 = sshll.u32 %s3743_s5, 4  ;;  %s2742_s30 = int_to_ptr.vmem [resolvable:$true] %s2741_s30 }
0x1a13   :  { %3602 = vtanh.f32 %v1956_v17  ;;  %s3703_s10 = scalar_lea.vmem %s2742_s30, 128  ;;  %p3708_p11 = scmp.lt.s32.totalorder %s2742_s30, %s2742_s30 }
0x1a14   :  { %p3704_p10 = scmp.ne.s32.totalorder %s2742_s30, %s3703_s10  ;;  %p3709_p12 = scmp.lt.s32.totalorder %s3703_s10, %s3703_s10 }
0x1a16   :  { %p3710_p13 = por %p3709_p12, %p3708_p11 }
0x1a18   :  { %p3711_p0 = pnand %p3710_p13, %p3704_p10 }
0x1a1d   :  { %v3603_v36 = vpop.eup %3602 }
0x1a1e   :  { %1962 = vrot.lane.b32.xlu0 %v3603_v36, %s3739_s22  ;;  %v1958_v37 = vmul.f32 0.5, %v3603_v36 }
0x1a20   :  { %v1959_v39 = vadd.f32 0.5, %v1958_v37 }
0x1a22   :  { %v1960_v45 = vmul.f32 %v1959_v39, %v4184_v44 }
0x1a90   :  { %v1963_v40 = vpop.permute.xlu0 %1962 }
0x1a91   :  { %v1965_v43 = vmul.f32 %v1963_v40, %v1959_v39 }
0x1a93   :  { %1967 = vrot.lane.b32.xlu0 %v1965_v43, %s3739_s22 }
0x1b05   :  { %v1968_v46 = vpop.permute.xlu0 %1967 }
0x1b06   :  { %v4251_v47 = vadd.f32 %v1968_v46, %v1960_v45 }
0x1b08   :  { %3604 = vtanh.f32 %v4251_v47 }
0x1b12   :  { %v3605_v48 = vpop.eup %3604 }
0x1b13   :  { %1973 = vrot.lane.b32.xlu0 %v3605_v48, %s3739_s22 }
0x1b85   :  { %v1974_v49 = vpop.permute.xlu0 %1973 }
0x1b86   :  { %v1976_v50 = vmul.f32 %v1974_v49, %v1959_v39 }
0x1b88   :  { %1978 = vrot.lane.b32.xlu0 %v1976_v50, %s3740_s23 }
0x1b8c   :  { %1982 = vrot.lane.b32.xlu0 %v1865_v19, %s3741_s26 }
0x1bfa   :  { %v1979_v51 = vpop.permute.xlu0 %1978 }
0x1bfb   :  { %3226 = vmatmul.mubr.msk.f32.vlgmr.msra.gmra.mrb[16].mxu0 %vm175_vm1, %v1979_v51 }
0x1bfc   :  { %3477 = vmatpush3.bf16.msra.mxu0 %v3879_v33  ;;  %3244 = vmatprep.mubr.msk.f32.mxu0 %vm3737_vm0, %v3738_v3 }
0x1bfd   :  { %3478 = vmatprep.subr.bf16.mxu0 %v3736_v2 }
0x1bfe   :  { %v1983_v44 = vpop.permute.xlu0 %1982 }
0x1bff   :  { %v1985_v53 = vsel %vm175_vm1, %v1979_v51, %v1983_v44 }
0x1c00   :  { %3215 = vmatmul.mubr.msk.f32.vlgmr.msra.gmra.mrb[18].mxu1 %vm281_vm2, %v1985_v53  ;;  %3480 = vmatpush3.bf16.msra.mxu0 %v3882_v35 }
0x1c01   :  { %3489 = vmatpush3.bf16.msra.mxu1 %v3844_v9  ;;  %3481 = vmatprep.subr.bf16.mxu0 %v3736_v2 }
0x1c02   :  { %3490 = vmatprep.subr.bf16.mxu1 %v3736_v2  ;;  %3255 = vmatprep.mubr.msk.f32.mxu1 %vm3737_vm0, %v3738_v3 }
0x1c04   :  { %3483 = vmatpush3.bf16.msra.mxu0 %v3886_v38 }
0x1c05   :  { %3492 = vmatpush3.bf16.msra.mxu1 %v3850_v13  ;;  %3484 = vmatprep.subr.bf16.mxu0 %v3736_v2 }
0x1c06   :  { %3493 = vmatprep.subr.bf16.mxu1 %v3736_v2 }
0x1c08   :  { %3486 = vmatpush3.bf16.msra.mxu0 %v3891_v42 }
0x1c09   :  { %3505 = vmatprep.subr.bf16.mxu0 %v3736_v2 }
0x1cce   :  { %v2165_v56 = vpop.f32.mrb[16].mxu0 }
0x1ccf   :  { %v3227_v57 = vpop.f32.mrb[17].mxu0 }
0x1cd3   :  { %v2055_v58 = vpop.f32.mrb[18].mxu1 }
0x1cd4   :  { %v2056_v60 = vadd.f32 %v4279_v59, %v2055_v58  ;;  %v3216_v61 = vpop.f32.mrb[19].mxu1 }
0x1cd6   :  { %3606 = vtanh.f32 %v2056_v60 }
0x1ce0   :  { %v3607_v62 = vpop.eup %3606 }
0x1ce1   :  { %2064 = vrot.lane.b32.xlu0 %v3607_v62, %s3739_s22  ;;  %v2060_v63 = vmul.f32 0.5, %v3607_v62 }
0x1ce3   :  { %v2061_v0 = vadd.f32 0.5, %v2060_v63 }
0x1ce5   :  { %v2062_v8 = vmul.f32 %v2061_v0, %v4221_v52 }
0x1d53   :  { %v2065_v5 = vpop.permute.xlu0 %2064 }
0x1d54   :  { %v2067_v6 = vmul.f32 %v2065_v5, %v2061_v0 }
0x1d56   :  { %2069 = vrot.lane.b32.xlu0 %v2067_v6, %s3739_s22 }
0x1dc8   :  { %v2070_v10 = vpop.permute.xlu0 %2069 }
0x1dc9   :  { %v4285_v12 = vadd.f32 %v2070_v10, %v2062_v8 }
0x1dcb   :  { %3608 = vtanh.f32 %v4285_v12 }
0x1dd5   :  { %v3609_v16 = vpop.eup %3608 }
0x1dd6   :  { %2075 = vrot.lane.b32.xlu1 %v3609_v16, %s3739_s22 }
0x1e48   :  { %v2076_v4 = vpop.permute.xlu1 %2075 }
0x1e49   :  { %v2078_v11 = vmul.f32 %v2076_v4, %v2061_v0 }
0x1e4b   :  { %v2079_v18 = vmul.f32 %v2078_v11, %v4225_v20 }
0x1e4d   :  { %2081 = vrot.lane.b32.xlu0 %v2079_v18, %s3740_s23 }
0x1ebf   :  { %v2082_v19 = vpop.permute.xlu0 %2081 }
0x1ec0   :  { %v2084_v21 = vsel %vm175_vm1, %v2082_v19, 0.0 }
0x1ec1   :  { %2085 = vadd.xlane.f32.xlu0 %v2084_v21 }
0x1f4e   :  { %v2086_v22 = vpop.xlane.xlu0 %2085 }
0x1f4f   :  { %v2087_v52 = vadd.f32 %v4230_v25, %v2086_v22 }
0x1f51   :  { %2091 = vperm.xlu1 %3537, %v2087_v52  }
0x1fd0   :  { %v4293_v23 = vpop.permute.xlu1 %2091 }
0x1fd1   :  { %v2095_v24 = vmul.f32 %v4238_v31, %v4293_v23 }
0x1fd3   :  { %v2096_v28 = vadd.f32 %v4245_v15, %v2095_v24 }
0x1fd5   :  { %v2169_v29 = vadd.f32 %v2165_v56, %v2096_v28 }
0x1fd7   :  { %3610 = vtanh.f32 %v2169_v29 }
0x1fe1   :  { %v3611_v32 = vpop.eup %3610 }
0x1fe2   :  { %2175 = vrot.lane.b32.xlu1 %v3611_v32, %s3739_s22  ;;  %v2171_v34 = vmul.f32 0.5, %v3611_v32 }
0x1fe4   :  { %v2172_v17 = vadd.f32 0.5, %v2171_v34 }
0x1fe6   :  { %v2173_v39 = vmul.f32 %v2172_v17, %v4251_v47 }
0x2054   :  { %v2176_v36 = vpop.permute.xlu1 %2175 }
0x2055   :  { %v2178_v37 = vmul.f32 %v2176_v36, %v2172_v17 }
0x2057   :  { %2180 = vrot.lane.b32.xlu1 %v2178_v37, %s3739_s22 }
0x20c9   :  { %v2181_v40 = vpop.permute.xlu1 %2180 }
0x20ca   :  { %v4301_v43 = vadd.f32 %v2181_v40, %v2173_v39 }
0x20cc   :  { %3612 = vtanh.f32 %v4301_v43 }
0x20d6   :  { %v3613_v45 = vpop.eup %3612 }
0x20d7   :  { %2186 = vrot.lane.b32.xlu1 %v3613_v45, %s3739_s22 }
0x2149   :  { %v2187_v46 = vpop.permute.xlu1 %2186 }
0x214a   :  { %v2189_v48 = vmul.f32 %v2187_v46, %v2172_v17 }
0x214c   :  { %2191 = vrot.lane.b32.xlu1 %v2189_v48, %s3740_s23 }
0x2150   :  { %2195 = vrot.lane.b32.xlu1 %v2078_v11, %s3741_s26 }
0x21be   :  { %v2192_v49 = vpop.permute.xlu1 %2191 }
0x21bf   :  { %3256 = vmatmul.mubr.msk.f32.vlgmr.msra.gmra.mrb[20].mxu1 %vm175_vm1, %v2192_v49 }
0x21c0   :  { %3495 = vmatpush3.bf16.msra.mxu1 %v3879_v33  ;;  %3274 = vmatprep.mubr.msk.f32.mxu1 %vm3737_vm0, %v3738_v3 }
0x21c1   :  { %3496 = vmatprep.subr.bf16.mxu1 %v3736_v2 }
0x21c2   :  { %v2196_v47 = vpop.permute.xlu1 %2195 }
0x21c3   :  { %v2198_v50 = vsel %vm175_vm1, %v2192_v49, %v2196_v47 }
0x21c4   :  { %3245 = vmatmul.mubr.msk.f32.vlgmr.msra.gmra.mrb[18].mxu0 %vm281_vm2, %v2198_v50  ;;  %3498 = vmatpush3.bf16.msra.mxu1 %v3882_v35 }
0x21c5   :  { %3507 = vmatpush3.bf16.msra.mxu0 %v3844_v9  ;;  %3499 = vmatprep.subr.bf16.mxu1 %v3736_v2 }
0x21c6   :  { %3508 = vmatprep.subr.bf16.mxu0 %v3736_v2  ;;  %3285 = vmatprep.mubr.msk.f32.mxu0 %vm3737_vm0, %v3738_v3 }
0x21c8   :  { %3501 = vmatpush3.bf16.msra.mxu1 %v3886_v38 }
0x21c9   :  { %3510 = vmatpush3.bf16.msra.mxu0 %v3850_v13  ;;  %3502 = vmatprep.subr.bf16.mxu1 %v3736_v2 }
0x21ca   :  { %3511 = vmatprep.subr.bf16.mxu0 %v3736_v2 }
0x21cc   :  { %3504 = vmatpush3.bf16.msra.mxu1 %v3891_v42 }
0x2292   :  { %v2378_v51 = vpop.f32.mrb[20].mxu1 }
0x2293   :  { %v3257_v44 = vpop.f32.mrb[21].mxu1 }
0x2297   :  { %v2268_v9 = vpop.f32.mrb[18].mxu0 }
0x2298   :  { %v2269_v53 = vadd.f32 %v4279_v59, %v2268_v9  ;;  %v3246_v56 = vpop.f32.mrb[19].mxu0 }
0x229a   :  { %3614 = vtanh.f32 %v2269_v53 }
0x22a4   :  { %v3615_v57 = vpop.eup %3614 }
0x22a5   :  { %2277 = vrot.lane.b32.xlu0 %v3615_v57, %s3739_s22  ;;  %v2273_v58 = vmul.f32 0.5, %v3615_v57 }
0x22a7   :  { %v2274_v60 = vadd.f32 0.5, %v2273_v58 }
0x22a9   :  { %v2275_v62 = vmul.f32 %v2274_v60, %v4285_v12 }
0x2317   :  { %v2278_v61 = vpop.permute.xlu0 %2277 }
0x2318   :  { %v2280_v13 = vmul.f32 %v2278_v61, %v2274_v60 }
0x231a   :  { %2282 = vrot.lane.b32.xlu1 %v2280_v13, %s3739_s22 }
0x238c   :  { %v2283_v63 = vpop.permute.xlu1 %2282 }
0x238d   :  { %v2285_v0 = vadd.f32 %v2283_v63, %v2275_v62 }
0x238f   :  { %3616 = vtanh.f32 %v2285_v0 }
0x2399   :  { %v3617_v5 = vpop.eup %3616 }
0x239a   :  { %2288 = vrot.lane.b32.xlu1 %v3617_v5, %s3739_s22 }
0x240c   :  { %v2289_v6 = vpop.permute.xlu1 %2288 }
0x240d   :  { %v2291_v8 = vmul.f32 %v2289_v6, %v2274_v60 }
0x240f   :  { %v2292_v10 = vmul.f32 %v2291_v8, %v4225_v20 }
0x2411   :  { %2294 = vrot.lane.b32.xlu1 %v2292_v10, %s3740_s23 }
0x2483   :  { %v2295_v16 = vpop.permute.xlu1 %2294 }
0x2484   :  { %v2297_v4 = vsel %vm175_vm1, %v2295_v16, 0.0 }
0x2485   :  { %2298 = vadd.xlane.f32.xlu1 %v2297_v4 }
0x2512   :  { %v2299_v11 = vpop.xlane.xlu1 %2298 }
0x2513   :  { %v2300_v18 = vadd.f32 %v4230_v25, %v2299_v11 }
0x2515   :  { %2304 = vperm.xlu0 %3536, %v2300_v18  }
0x2594   :  { %v4334_v12 = vpop.permute.xlu0 %2304 }
0x2595   :  { %v2308_v19 = vmul.f32 %v4238_v31, %v4334_v12 }
0x2597   :  { %v2309_v21 = vadd.f32 %v4245_v15, %v2308_v19 }
0x2599   :  { %v2382_v22 = vadd.f32 %v2378_v51, %v2309_v21 }
0x259b   :  { %3618 = vtanh.f32 %v2382_v22 }
0x25a5   :  { %v3619_v52 = vpop.eup %3618 }
0x25a6   :  { %2388 = vrot.lane.b32.xlu0 %v3619_v52, %s3739_s22  ;;  %v2384_v24 = vmul.f32 0.5, %v3619_v52 }
0x25a8   :  { %v2385_v28 = vadd.f32 0.5, %v2384_v24 }
0x25aa   :  { %v2386_v34 = vmul.f32 %v2385_v28, %v4301_v43 }
0x2618   :  { %v2389_v29 = vpop.permute.xlu0 %2388 }
0x2619   :  { %v2391_v32 = vmul.f32 %v2389_v29, %v2385_v28 }
0x261b   :  { %2393 = vrot.lane.b32.xlu0 %v2391_v32, %s3739_s22 }
0x268d   :  { %v2394_v17 = vpop.permute.xlu0 %2393 }
0x268e   :  { %v2396_v36 = vadd.f32 %v2394_v17, %v2386_v34 }
0x2690   :  { %3620 = vtanh.f32 %v2396_v36 }
0x269a   :  { %v3621_v37 = vpop.eup %3620 }
0x269b   :  { %2399 = vrot.lane.b32.xlu0 %v3621_v37, %s3739_s22 }
0x270d   :  { %v2400_v39 = vpop.permute.xlu0 %2399 }
0x270e   :  { %v2402_v40 = vmul.f32 %v2400_v39, %v2385_v28 }
0x2710   :  { %2404 = vrot.lane.b32.xlu0 %v2402_v40, %s3740_s23 }
0x2714   :  { %2408 = vrot.lane.b32.xlu0 %v2291_v8, %s3741_s26 }
0x2782   :  { %v2405_v45 = vpop.permute.xlu0 %2404 }
0x2783   :  { %3286 = vmatmul.mubr.msk.f32.vlgmr.msra.gmra.mrb[20].mxu0 %vm175_vm1, %v2405_v45 }
0x2784   :  { %3513 = vmatpush3.bf16.msra.mxu0 %v3879_v33  ;;  %3304 = vmatprep.mubr.msk.f32.mxu0 %vm3737_vm0, %v3738_v3 }
0x2785   :  { %3514 = vmatprep.subr.bf16.mxu0 %v3736_v2 }
0x2786   :  { %v2409_v43 = vpop.permute.xlu0 %2408 }
0x2787   :  { %v2411_v46 = vsel %vm175_vm1, %v2405_v45, %v2409_v43 }
0x2788   :  { %3275 = vmatmul.mubr.msk.f32.vlgmr.msra.gmra.mrb[22].mxu1 %vm281_vm2, %v2411_v46  ;;  %3516 = vmatpush3.bf16.msra.mxu0 %v3882_v35 }
0x2789   :  { %3517 = vmatprep.subr.bf16.mxu0 %v3736_v2 }
0x278c   :  { %3519 = vmatpush3.bf16.msra.mxu0 %v3886_v38 }
0x278d   :  { %3520 = vmatprep.subr.bf16.mxu0 %v3736_v2 }
0x2790   :  { %3522 = vmatpush3.bf16.msra.mxu0 %v3891_v42 }
0x2856   :  { %v2591_v33 = vpop.f32.mrb[20].mxu0 }
0x2857   :  { %v3287_v48 = vpop.f32.mrb[21].mxu0 }
0x285b   :  { %v2481_v3 = vpop.f32.mrb[22].mxu1 }
0x285c   :  { %v2482_v49 = vadd.f32 %v4279_v59, %v2481_v3  ;;  %v3276_v47 = vpop.f32.mrb[23].mxu1  ;;  %v811_v3 = vmul.f32 %v4024_v55, %v4225_v20 }
0x285e   :  { %3622 = vtanh.f32 %v2482_v49 }
0x2868   :  { %v3623_v50 = vpop.eup %3622 }
0x2869   :  { %2490 = vrot.lane.b32.xlu0 %v3623_v50, %s3739_s22  ;;  %v2486_v51 = vmul.f32 0.5, %v3623_v50 }
0x286b   :  { %v2487_v35 = vadd.f32 0.5, %v2486_v51 }
0x286d   :  { %v2488_v38 = vmul.f32 %v2487_v35, %v2285_v0 }
0x28db   :  { %v2491_v44 = vpop.permute.xlu0 %2490 }
0x28dc   :  { %v2493_v9 = vmul.f32 %v2491_v44, %v2487_v35 }
0x28de   :  { %2495 = vrot.lane.b32.xlu0 %v2493_v9, %s3739_s22  ;;  %v4399_v9 = vand.u32 127, %v89_v1  ;;  %v1444_v1 = vmul.f32 %v4153_v14, %v4225_v20 }
0x28e0   :  { %vm398_vm3 = vcmp.eq.s32.totalorder %v4399_v9, 0  ;;  %vm609_vm4 = vcmp.eq.s32.totalorder %v4399_v9, 1  ;;  %vm820_vm5 = vcmp.eq.s32.totalorder %v4399_v9, 2  ;;  %vm1031_vm6 = vcmp.eq.s32.totalorder %v4399_v9, 3 }
0x28e1   :  { %vm1242_vm7 = vcmp.eq.s32.totalorder %v4399_v9, 4  ;;  %vm1453_vm8 = vcmp.eq.s32.totalorder %v4399_v9, 5  ;;  %vm1664_vm9 = vcmp.eq.s32.totalorder %v4399_v9, 6  ;;  %vm1875_vm10 = vcmp.eq.s32.totalorder %v4399_v9, 7 }
0x28e2   :  { %vm2088_vm11 = vcmp.eq.s32.totalorder %v4399_v9, 8  ;;  %vm2301_vm12 = vcmp.eq.s32.totalorder %v4399_v9, 9  ;;  %vm2514_vm13 = vcmp.eq.s32.totalorder %v4399_v9, 10  ;;  %vm2727_vm14 = vcmp.eq.s32.totalorder %v4399_v9, 11 }
0x2950   :  { %v2496_v2 = vpop.permute.xlu0 %2495 }
0x2951   :  { %v4360_v53 = vadd.f32 %v2496_v2, %v2488_v38 }
0x2953   :  { %3624 = vtanh.f32 %v4360_v53 }
0x295d   :  { %v3625_v42 = vpop.eup %3624 }
0x295e   :  { %2501 = vrot.lane.b32.xlu1 %v3625_v42, %s3739_s22 }
0x29d0   :  { %v2502_v56 = vpop.permute.xlu1 %2501 }
0x29d1   :  { %v2504_v57 = vmul.f32 %v2502_v56, %v2487_v35  ;;  %v1022_v56 = vmul.f32 %v4067_v41, %v4225_v20 }
0x29d3   :  { %v2505_v58 = vmul.f32 %v2504_v57, %v4225_v20 }
0x29d5   :  { %2507 = vrot.lane.b32.xlu0 %v2505_v58, %s3740_s23 }
0x2a47   :  { %v2508_v60 = vpop.permute.xlu0 %2507 }
0x2a48   :  { %v2510_v61 = vsel %vm175_vm1, %v2508_v60, 0.0 }
0x2a49   :  { %2511 = vadd.xlane.f32.xlu0 %v2510_v61  ;;  %v1655_v61 = vmul.f32 %v4191_v54, %v4225_v20 }
0x2ad6   :  { %v2512_v13 = vpop.xlane.xlu0 %2511 }
0x2ad7   :  { %v2513_v62 = vadd.f32 %v4230_v25, %v2512_v13 }
0x2ad9   :  { %2517 = vperm.xlu1 %3537, %v2513_v62  }
0x2b58   :  { %v4368_v63 = vpop.permute.xlu1 %2517 }
0x2b59   :  { %v2521_v0 = vmul.f32 %v4238_v31, %v4368_v63 }
0x2b5b   :  { %v2522_v5 = vadd.f32 %v4245_v15, %v2521_v0 }
0x2b5d   :  { %v2595_v6 = vadd.f32 %v2591_v33, %v2522_v5 }
0x2b5f   :  { %3626 = vtanh.f32 %v2595_v6 }
0x2b69   :  { %v3627_v8 = vpop.eup %3626 }
0x2b6a   :  { %2601 = vrot.lane.b32.xlu1 %v3627_v8, %s3739_s22  ;;  %v2597_v10 = vmul.f32 0.5, %v3627_v8 }
0x2b6c   :  { %v2598_v16 = vadd.f32 0.5, %v2597_v10 }
0x2b6e   :  { %v2599_v18 = vmul.f32 %v2598_v16, %v2396_v36  ;;  %v600_v36 = vmul.f32 %v3980_v7, %v4225_v20 }
0x2bdc   :  { %v2602_v4 = vpop.permute.xlu1 %2601 }
0x2bdd   :  { %v2604_v11 = vmul.f32 %v2602_v4, %v2598_v16 }
0x2bdf   :  { %2606 = vrot.lane.b32.xlu1 %v2604_v11, %s3739_s22 }
0x2c51   :  { %v2607_v19 = vpop.permute.xlu1 %2606 }
0x2c52   :  { %v2609_v21 = vadd.f32 %v2607_v19, %v2599_v18 }
0x2c54   :  { %3628 = vtanh.f32 %v2609_v21 }
0x2c5e   :  { %v3629_v22 = vpop.eup %3628 }
0x2c5f   :  { %2612 = vrot.lane.b32.xlu1 %v3629_v22, %s3739_s22 }
0x2cd1   :  { %v2613_v31 = vpop.permute.xlu1 %2612 }
0x2cd2   :  { %v2615_v15 = vmul.f32 %v2613_v31, %v2598_v16 }
0x2cd4   :  { %2617 = vrot.lane.b32.xlu1 %v2615_v15, %s3740_s23 }
0x2cd8   :  { %2621 = vrot.lane.b32.xlu1 %v2504_v57, %s3741_s26  ;;  %v1233_v57 = vmul.f32 %v4110_v27, %v4225_v20 }
0x2d46   :  { %v2618_v52 = vpop.permute.xlu1 %2617 }
0x2d4a   :  { %v2622_v24 = vpop.permute.xlu1 %2621 }
0x2d4b   :  { %v2624_v28 = vsel %vm175_vm1, %v2618_v52, %v2622_v24 }
0x2d4c   :  { %3305 = vmatmul.mubr.msk.f32.vlgmr.msra.gmra.mrb[22].mxu0 %vm281_vm2, %v2624_v28 }
0x2e1f   :  { %v2694_v29 = vpop.f32.mrb[22].mxu0 }
0x2e20   :  { %v2695_v32 = vadd.f32 %v4279_v59, %v2694_v29  ;;  %v3306_v34 = vpop.f32.mrb[23].mxu0  ;;  %v383_v59 = vmul.f32 %v4225_v20, %v3940_v26 }
0x2e22   :  { %3630 = vtanh.f32 %v2695_v32 }
0x2e2c   :  { %v3631_v17 = vpop.eup %3630 }
0x2e2d   :  { %2703 = vrot.lane.b32.xlu0 %v3631_v17, %s3739_s22  ;;  %v2699_v37 = vmul.f32 0.5, %v3631_v17 }
0x2e2f   :  { %v2700_v39 = vadd.f32 0.5, %v2699_v37 }
0x2e31   :  { %602 = vrot.lane.b32.xlu0 %v600_v36, %s3740_s23  ;;  %v2701_v49 = vmul.f32 %v2700_v39, %v4360_v53 }
0x2e9f   :  { %v2704_v40 = vpop.permute.xlu0 %2703 }
0x2ea0   :  { %v2706_v45 = vmul.f32 %v2704_v40, %v2700_v39 }
0x2ea2   :  { %2708 = vrot.lane.b32.xlu1 %v2706_v45, %s3739_s22 }
0x2ea3   :  { %v603_v43 = vpop.permute.xlu0 %602 }
0x2ea4   :  { %v605_v46 = vsel %vm175_vm1, %v603_v43, 0.0 }
0x2ea5   :  { %606 = vadd.xlane.f32.xlu0 %v605_v46 }
0x2ea6   :  { %385 = vrot.lane.b32.xlu1 %v383_v59, %s3740_s23 }
0x2f14   :  { %v2709_v33 = vpop.permute.xlu1 %2708 }
0x2f15   :  { %v2711_v47 = vadd.f32 %v2709_v33, %v2701_v49 }
0x2f17   :  { %3632 = vtanh.f32 %v2711_v47 }
0x2f18   :  { %v386_v48 = vpop.permute.xlu1 %385 }
0x2f19   :  { %v388_v7 = vsel %vm175_vm1, %v386_v48, 0.0 }
0x2f1a   :  { %389 = vadd.xlane.f32.xlu1 %v388_v7 }
0x2f21   :  { %v3633_v44 = vpop.eup %3632 }
0x2f2b   :  { %813 = vrot.lane.b32.xlu1 %v811_v3, %s3740_s23 }
0x2f32   :  { %v607_v55 = vpop.xlane.xlu0 %606 }
0x2fa7   :  { %v390_v50 = vpop.xlane.xlu1 %389 }
0x2fa8   :  { %v397_v26 = vadd.f32 %v4230_v25, %v390_v50 }
0x2faa   :  { %401 = vperm.xlu0 %3536, %v397_v26  }
0x2fab   :  { %v814_v51 = vpop.permute.xlu1 %813 }
0x2fac   :  { %v816_v35 = vsel %vm175_vm1, %v814_v51, 0.0 }
0x2fad   :  { %817 = vadd.xlane.f32.xlu1 %v816_v35 }
0x2fae   :  { %2714 = vrot.lane.b32.xlu0 %v3633_v44, %s3739_s22 }
0x3029   :  { %v402_v38 = vpop.permute.xlu0 %401 }
0x302a   :  { %v404_v2 = vsel %vm398_vm3, %v402_v38, 0.0 }
0x302d   :  { %v2715_v58 = vpop.permute.xlu0 %2714 }
0x302e   :  { %v2717_v60 = vmul.f32 %v2715_v58, %v2700_v39 }
0x3030   :  { %v2718_v41 = vmul.f32 %v2717_v60, %v4225_v20  ;;  %v608_v20 = vadd.f32 %v4230_v25, %v607_v55 }
0x303a   :  { %v818_v53 = vpop.xlane.xlu1 %817 }
0x303b   :  { %v819_v42 = vadd.f32 %v4230_v25, %v818_v53 }
0x303d   :  { %823 = vperm.xlu0 %3536, %v819_v42  }
0x3041   :  { %1024 = vrot.lane.b32.xlu0 %v1022_v56, %s3740_s23 }
0x3045   :  { %1235 = vrot.lane.b32.xlu0 %v1233_v57, %s3740_s23 }
0x3049   :  { %1446 = vrot.lane.b32.xlu0 %v1444_v1, %s3740_s23 }
0x304d   :  { %1657 = vrot.lane.b32.xlu0 %v1655_v61, %s3740_s23 }
0x3051   :  { %2720 = vrot.lane.b32.xlu0 %v2718_v41, %s3740_s23 }
0x30bc   :  { %v824_v13 = vpop.permute.xlu0 %823 }
0x30c0   :  { %v1025_v27 = vpop.permute.xlu0 %1024 }
0x30c1   :  { %v1027_v62 = vsel %vm175_vm1, %v1025_v27, 0.0 }
0x30c2   :  { %1028 = vadd.xlane.f32.xlu1 %v1027_v62 }
0x30c4   :  { %v1236_v0 = vpop.permute.xlu0 %1235 }
0x30c5   :  { %v1238_v14 = vsel %vm175_vm1, %v1236_v0, 0.0 }
0x30c6   :  { %1239 = vadd.xlane.f32.xlu1 %v1238_v14 }
0x30c8   :  { %v1447_v5 = vpop.permute.xlu0 %1446 }
0x30c9   :  { %v1449_v52 = vsel %vm175_vm1, %v1447_v5, 0.0 }
0x30cc   :  { %v1658_v6 = vpop.permute.xlu0 %1657 }
0x30cd   :  { %v1660_v8 = vsel %vm175_vm1, %v1658_v6, 0.0 }
0x30ce   :  { %1661 = vadd.xlane.f32.xlu1 %v1660_v8 }
0x30d0   :  { %v2721_v54 = vpop.permute.xlu0 %2720 }
0x30d1   :  { %v2723_v10 = vsel %vm175_vm1, %v2721_v54, 0.0 }
0x30d2   :  { %2724 = vadd.xlane.f32.xlu1 %v2723_v10 }
0x30e3   :  { %612 = vperm.xlu1 %3537, %v608_v20  }
0x314f   :  { %v1029_v16 = vpop.xlane.xlu1 %1028 }
0x3150   :  { %v1030_v4 = vadd.f32 %v4230_v25, %v1029_v16 }
0x3152   :  { %1034 = vperm.xlu0 %3536, %v1030_v4  }
0x3153   :  { %v1240_v11 = vpop.xlane.xlu1 %1239 }
0x3154   :  { %v1241_v18 = vadd.f32 %v4230_v25, %v1240_v11 }
0x3156   :  { %1245 = vperm.xlu1 %3537, %v1241_v18  }
0x315b   :  { %v1662_v19 = vpop.xlane.xlu1 %1661 }
0x315c   :  { %v1663_v37 = vadd.f32 %v4230_v25, %v1662_v19 }
0x315f   :  { %v2725_v21 = vpop.xlane.xlu1 %2724 }
0x3160   :  { %v2726_v24 = vadd.f32 %v4230_v25, %v2725_v21 }
0x3163   :  { %v613_v22 = vpop.permute.xlu1 %612 }
0x3164   :  { %v615_v31 = vsel %vm609_vm4, %v613_v22, %v404_v2 }
0x3165   :  { %v826_v15 = vsel %vm820_vm5, %v824_v13, %v615_v31 }
0x3171   :  { %1450 = vadd.xlane.f32.xlu0 %v1449_v52 }
0x3187   :  { %2730 = vperm.xlu0 %3536, %v2726_v24  }
0x31d1   :  { %v1035_v28 = vpop.permute.xlu0 %1034 }
0x31d2   :  { %v1037_v29 = vsel %vm1031_vm6, %v1035_v28, %v826_v15 }
0x31d5   :  { %v1246_v32 = vpop.permute.xlu1 %1245 }
0x31d6   :  { %v1248_v34 = vsel %vm1242_vm7, %v1246_v32, %v1037_v29 }
0x31fe   :  { %v1451_v17 = vpop.xlane.xlu0 %1450 }
0x31ff   :  { %v1452_v36 = vadd.f32 %v4230_v25, %v1451_v17 }
0x3201   :  { %1456 = vperm.xlu1 %3537, %v1452_v36  }
0x3205   :  { %1667 = vperm.xlu1 %3537, %v1663_v37  }
0x3206   :  { %v2731_v33 = vpop.permute.xlu0 %2730 }
0x3280   :  { %v1457_v39 = vpop.permute.xlu1 %1456 }
0x3281   :  { %v1459_v40 = vsel %vm1453_vm8, %v1457_v39, %v1248_v34 }
0x3284   :  { %v1668_v45 = vpop.permute.xlu1 %1667 }
0x3285   :  { %v1670_v43 = vsel %vm1664_vm9, %v1668_v45, %v1459_v40 }
0x3286   :  { %v1881_v46 = vsel %vm1875_vm10, %v4233_v30, %v1670_v43 }
0x3287   :  { %v2094_v25 = vsel %vm2088_vm11, %v4293_v23, %v1881_v46 }
0x3288   :  { %v2307_v59 = vsel %vm2301_vm12, %v4334_v12, %v2094_v25 }
0x3289   :  { %v2520_v48 = vsel %vm2514_vm13, %v4368_v63, %v2307_v59 }
0x328a   :  { %v2733_v7 = vsel %vm2727_vm14, %v2731_v33, %v2520_v48 }
0x328b   :  { %2734 = vst [vmem:[#allocation9] sm:$0xff] %v2733_v7 }
0x328c   :  { %3714 = shalt.err (!%p3711_p0)
}
0x328d   :  { %s3715_s13 = scalar_lea.hbm %s4463_s8, 128 }
0x328e   :  { %p3716_p1 = scmp.ne.s32.totalorder %s4463_s8, %s3715_s13  ;;  %p3719_p2 = scmp.lt.u32.totalorder %s3715_s13, %s4463_s8 }
0x3290   :  { %p3721_p3 = pnand %p3719_p2, %p3716_p1 }
0x3292   :  { %3724 = shalt.err (!%p3721_p3)
}
0x3293   :  { %2744 = dma.vmem_to_hbm [thread:$0]  %s2742_s30, 128, %s4463_s8, [#allocation5]  }
0x3294   :  { %3729 = dma.done.wait [#allocation5], 128  }
0x3295   :  { %3730 = vsyncadd [#allocation5], 4294967168 }
0x3296   :  { %2748 = vsyncpa [#allocation4], 1 }
0x3297   :  { %2749 = vsyncpa [#allocation7], 1 }
0x3298   :  { %2750 = vsyncpa [#allocation5], 1 }

</bundles_post_ra>
